<compile_context>
chip_gen: v7x
topology: tpu7x:2x2x1
jax: 0.10.0
libtpu: 0.0.40
codegen_flags: <defaults>
</compile_context>

<pallas_src>
import math

import jax
import jax.numpy as jnp
import numpy as np
from jax.experimental import pallas as pl
from jax.experimental.pallas import tpu as pltpu

# ---- module config (in_channels must equal inner_dim; norm1 is applied pre-proj_in) ----
IN_CHANNELS = 32
NUM_HEADS = 4
HEAD_DIM = 8
INNER = NUM_HEADS * HEAD_DIM        # 32 == IN_CHANNELS
LN_EPS = 1e-5
ATTN_SCALE = 1.0 / math.sqrt(HEAD_DIM)

# packed-parameter slab layout (rows; all offsets are multiples of 8)
_ROW_W1 = 0                          # [INNER, INNER]  ln1-folded proj_in weight
_ROW_WQKV = INNER                    # [INNER, 3*INNER] ln2-folded fused Q/K/V weight
_ROW_WO = 2 * INNER                  # [INNER, INNER]  to_out[0] @ proj_out
_ROW_B1 = 3 * INNER                  # [1, INNER]      ln1-folded proj_in bias
_ROW_BQKV = 3 * INNER + 8            # [1, 3*INNER]    ln2-folded QKV bias
_ROW_BO = 3 * INNER + 16             # [1, INNER]      fused output bias
_PACK_ROWS = 3 * INNER + 24
_PACK_COLS = 3 * INNER


def _layernorm_fp32(x):
    """FP32LayerNorm without affine (affine folded into the following linear)."""
    x32 = x.astype(jnp.float32)
    mu = jnp.mean(x32, axis=-1, keepdims=True)
    var = jnp.mean(jnp.square(x32 - mu), axis=-1, keepdims=True)
    return (x32 - mu) * jax.lax.rsqrt(var + LN_EPS)


def _global_transformer_kernel(x_ref, p_ref, o_ref):
    """x_ref/o_ref: [BC, S, C]; p_ref: packed parameter slab [_PACK_ROWS, _PACK_COLS]."""
    BC, S, C = x_ref.shape

    # static slices of the packed parameter slab (one DMA for all params)
    w1 = p_ref[_ROW_W1:_ROW_W1 + INNER, 0:INNER]
    wqkv = p_ref[_ROW_WQKV:_ROW_WQKV + INNER, 0:3 * INNER]
    wo = p_ref[_ROW_WO:_ROW_WO + INNER, 0:INNER]
    b1 = p_ref[_ROW_B1:_ROW_B1 + 1, 0:INNER]
    bqkv = p_ref[_ROW_BQKV:_ROW_BQKV + 1, 0:3 * INNER]
    bo = p_ref[_ROW_BO:_ROW_BO + 1, 0:INNER]

    # flatten the batch chunk into rows: all non-attention work is one big-M tile
    x = x_ref[...].reshape(BC * S, C)                 # residual + LN input (f32)

    # norm1 (affine folded into w1/b1) + proj_in
    h = _layernorm_fp32(x)
    h = jnp.dot(h, w1, preferred_element_type=jnp.float32) + b1
    # norm2 (affine folded into wqkv/bqkv) + fused Q/K/V projection (3 matmuls -> 1)
    h = _layernorm_fp32(h)
    qkv = jnp.dot(h, wqkv, preferred_element_type=jnp.float32) + bqkv

    # attention operands in bf16, f32 accumulation on the MXU
    q = qkv[:, 0:INNER].reshape(BC, S, INNER).astype(jnp.bfloat16)
    k = qkv[:, INNER:2 * INNER].reshape(BC, S, INNER).astype(jnp.bfloat16)
    v = qkv[:, 2 * INNER:3 * INNER].reshape(BC, S, INNER).astype(jnp.bfloat16)

    # multi-head self-attention; each head's output is projected through its slice of
    # the fused (to_out[0] @ proj_out) weight and accumulated -> no concat needed.
    acc = jnp.zeros((BC * S, INNER), jnp.float32)
    for hd in range(NUM_HEADS):                       # static loop over heads
        sl = slice(hd * HEAD_DIM, (hd + 1) * HEAD_DIM)
        qh, kh, vh = q[:, :, sl], k[:, :, sl], v[:, :, sl]        # [BC, S, D]
        s = jnp.einsum("bqd,bkd->bqk", qh, kh,
                       preferred_element_type=jnp.float32) * ATTN_SCALE   # [BC, S, S]
        s = s - jnp.max(s, axis=-1, keepdims=True)
        e = jnp.exp(s)
        l = jnp.sum(e, axis=-1, keepdims=True)                    # [BC, S, 1]
        pv = jnp.einsum("bqk,bkd->bqd", e.astype(jnp.bfloat16), vh,
                        preferred_element_type=jnp.float32)       # [BC, S, D]
        # deferred softmax normalization: one [S,1] multiply via EUP reciprocal
        pv = pv * pl.reciprocal(l, approx=True)
        acc = acc + jnp.dot(pv.reshape(BC * S, HEAD_DIM), wo[sl, :],
                            preferred_element_type=jnp.float32)   # [BC*S, C]

    # fused (to_out bias @ proj_out + proj_out bias) + residual
    out = acc + bo + x
    o_ref[...] = out.reshape(BC, S, C).astype(o_ref.dtype)


def _pack_params(p):
    """Fold LN affines into adjacent linears, fuse QKV and O/proj_out, pack into one slab."""
    C = INNER
    ln1_w = p["ln1_w"].reshape(1, C)
    ln1_b = p["ln1_b"].reshape(1, C)
    ln2_w = p["ln2_w"].reshape(1, C)
    ln2_b = p["ln2_b"].reshape(1, C)

    # norm1 affine folded into proj_in:  (n*w1 + b1) @ Win = n @ (diag(w1) Win) + b1 @ Win
    w1 = p["w_in"] * ln1_w.reshape(C, 1)
    b1 = ln1_b @ p["w_in"] + p["b_in"]

    # norm2 affine folded into fused Q/K/V
    wqkv_raw = jnp.concatenate([p["w_q"], p["w_k"], p["w_v"]], axis=1)     # [C, 3C]
    wqkv = wqkv_raw * ln2_w.reshape(C, 1)
    bqkv = ln2_b @ wqkv_raw

    # to_out[0] composed with proj_out
    wo = p["w_o"] @ p["w_out"]                                             # [C, C]
    bo = p["b_o"] @ p["w_out"] + p["b_out"]                                # [1, C]

    pack = jnp.zeros((_PACK_ROWS, _PACK_COLS), jnp.float32)
    pack = pack.at[_ROW_W1:_ROW_W1 + C, 0:C].set(w1)
    pack = pack.at[_ROW_WQKV:_ROW_WQKV + C, 0:3 * C].set(wqkv)
    pack = pack.at[_ROW_WO:_ROW_WO + C, 0:C].set(wo)
    pack = pack.at[_ROW_B1, 0:C].set(b1[0])
    pack = pack.at[_ROW_BQKV, 0:3 * C].set(bqkv[0])
    pack = pack.at[_ROW_BO, 0:C].set(bo[0])
    return pack


def _pick_batch_block(B, S):
    """Largest divisor of B whose per-step [BC,S,S] score tiles fit comfortably in VMEM."""
    best = 1
    for d in range(1, B + 1):
        if B % d == 0 and d * S <= 4096 and d * S * S * 8 <= (8 << 20):
            best = d
    return best


def global_transformer_3d(x, params, *, batch_block=None):
    """x: [B, C, F, H, W] float32 -> [B, C, F, H, W]."""
    B, C, F, H, W = x.shape
    assert C == IN_CHANNELS
    S = F * H * W
    xs = jnp.transpose(x, (0, 2, 3, 4, 1)).reshape(B, S, C)   # b c f h w -> b (f h w) c

    p_pack = _pack_params(params)

    if batch_block is None:
        batch_block = _pick_batch_block(B, S)
    if B % batch_block != 0:
        raise ValueError("batch_block must divide B")
    grid = (B // batch_block,)

    out = pl.pallas_call(
        _global_transformer_kernel,
        out_shape=jax.ShapeDtypeStruct((B, S, C), x.dtype),
        grid_spec=pltpu.PrefetchScalarGridSpec(
            num_scalar_prefetch=0,
            grid=grid,
            in_specs=[
                pl.BlockSpec((batch_block, S, C), lambda i: (i, 0, 0)),
                pl.BlockSpec(p_pack.shape, lambda i: (0, 0)),
            ],
            out_specs=pl.BlockSpec((batch_block, S, C), lambda i: (i, 0, 0)),
        ),
        compiler_params=pltpu.CompilerParams(
            dimension_semantics=("parallel",),      # batch chunks are independent (v7x 2 TCs)
            vmem_limit_bytes=32 << 20,
        ),
    )(xs, p_pack)

    return jnp.transpose(out.reshape(B, F, H, W, C), (0, 4, 1, 2, 3))


def init_params(key):
    """Deterministic synthetic parameters (linear weights stored as [in, out])."""
    ks = jax.random.split(key, 13)
    scale = 0.05
    return {
        # non-trivial LN params so the affine-folding path is actually exercised
        "ln1_w": 1.0 + 0.1 * jax.random.normal(ks[0], (1, INNER), jnp.float32),
        "ln1_b": 0.05 * jax.random.normal(ks[1], (1, INNER), jnp.float32),
        "ln2_w": 1.0 + 0.1 * jax.random.normal(ks[2], (1, INNER), jnp.float32),
        "ln2_b": 0.05 * jax.random.normal(ks[3], (1, INNER), jnp.float32),
        "w_in": scale * jax.random.normal(ks[4], (IN_CHANNELS, INNER), jnp.float32),
        "b_in": scale * jax.random.normal(ks[5], (1, INNER), jnp.float32),
        "w_q": scale * jax.random.normal(ks[6], (INNER, INNER), jnp.float32),
        "w_k": scale * jax.random.normal(ks[7], (INNER, INNER), jnp.float32),
        "w_v": scale * jax.random.normal(ks[8], (INNER, INNER), jnp.float32),
        "w_o": scale * jax.random.normal(ks[9], (INNER, INNER), jnp.float32),
        "b_o": scale * jax.random.normal(ks[10], (1, INNER), jnp.float32),
        "w_out": scale * jax.random.normal(ks[11], (INNER, IN_CHANNELS), jnp.float32),
        "b_out": scale * jax.random.normal(ks[12], (1, IN_CHANNELS), jnp.float32),
    }


def ref_forward(x, p):
    """Pure-JAX reference of the PyTorch forward (f32 everywhere) for validation."""
    B, C, F, H, W = x.shape
    S = F * H * W
    xs = jnp.transpose(x, (0, 2, 3, 4, 1)).reshape(B, S, C)
    res = xs

    def ln(z, w, b):
        z = z.astype(jnp.float32)
        mu = jnp.mean(z, axis=-1, keepdims=True)
        var = jnp.mean(jnp.square(z - mu), axis=-1, keepdims=True)
        return (z - mu) * jax.lax.rsqrt(var + LN_EPS) * w + b

    h = ln(xs, p["ln1_w"], p["ln1_b"])
    h = h @ p["w_in"] + p["b_in"]
    h = ln(h, p["ln2_w"], p["ln2_b"])
    q = (h @ p["w_q"]).reshape(B, S, NUM_HEADS, HEAD_DIM)
    k = (h @ p["w_k"]).reshape(B, S, NUM_HEADS, HEAD_DIM)
    v = (h @ p["w_v"]).reshape(B, S, NUM_HEADS, HEAD_DIM)
    s = jnp.einsum("bqhd,bkhd->bhqk", q, k) * ATTN_SCALE
    a = jax.nn.softmax(s, axis=-1)
    o = jnp.einsum("bhqk,bkhd->bqhd", a, v).reshape(B, S, INNER)
    o = o @ p["w_o"] + p["b_o"]
    o = o @ p["w_out"] + p["b_out"]
    out = o + res
    return jnp.transpose(out.reshape(B, F, H, W, C), (0, 4, 1, 2, 3))


if __name__ == "__main__":
    B, F, H, W = 2, 2, 4, 4
    kx, kp = jax.random.split(jax.random.PRNGKey(0))
    x = jax.random.normal(kx, (B, IN_CHANNELS, F, H, W), jnp.float32)
    params = init_params(kp)

    out = jax.block_until_ready(global_transformer_3d(x, params))

    ref = ref_forward(x, params)
    np.testing.assert_allclose(np.asarray(out), np.asarray(ref), rtol=1e-2, atol=1e-2)

    print("KERNEL_OK")
</pallas_src>

<mosaic_0001>
module attributes {stable_mosaic.version = 11 : i64} {
  func.func @_global_transformer_kernel(%arg0: i32, %arg1: memref<2x32x32xf32, #tpu.memory_space<vmem>>, %arg2: memref<120x96xf32, #tpu.memory_space<vmem>>, %arg3: memref<2x32x32xf32, #tpu.memory_space<vmem>>) attributes {dimension_semantics = [#tpu.dimension_semantics<parallel>], iteration_bounds = array<i64: 1>, scalar_prefetch = 0 : i64, scratch_operands = 0 : i64, tpu.core_type = #tpu.core_type<tc>, window_params = [{transform_indices = @transform_0, window_bounds = array<i64: 2, 32, 32>}, {pipeline_mode = #tpu.pipeline_mode<synchronous>, transform_indices = @transform_1, window_bounds = array<i64: 120, 96>}, {transform_indices = @transform_2, window_bounds = array<i64: 2, 32, 32>}]} {
    %c0 = arith.constant 0 : index
    %c0_0 = arith.constant 0 : index
    %0 = vector.load %arg2[%c0, %c0_0] : memref<120x96xf32, #tpu.memory_space<vmem>>, vector<32x32xf32>
    %c32 = arith.constant 32 : index
    %c0_1 = arith.constant 0 : index
    %1 = vector.load %arg2[%c32, %c0_1] : memref<120x96xf32, #tpu.memory_space<vmem>>, vector<32x96xf32>
    %c64 = arith.constant 64 : index
    %c0_2 = arith.constant 0 : index
    %2 = vector.load %arg2[%c64, %c0_2] : memref<120x96xf32, #tpu.memory_space<vmem>>, vector<32x32xf32>
    %c96 = arith.constant 96 : index
    %c0_3 = arith.constant 0 : index
    %3 = vector.load %arg2[%c96, %c0_3] : memref<120x96xf32, #tpu.memory_space<vmem>>, vector<1x32xf32>
    %c104 = arith.constant 104 : index
    %c0_4 = arith.constant 0 : index
    %4 = vector.load %arg2[%c104, %c0_4] : memref<120x96xf32, #tpu.memory_space<vmem>>, vector<1x96xf32>
    %c112 = arith.constant 112 : index
    %c0_5 = arith.constant 0 : index
    %5 = vector.load %arg2[%c112, %c0_5] : memref<120x96xf32, #tpu.memory_space<vmem>>, vector<1x32xf32>
    %c0_6 = arith.constant 0 : index
    %c0_7 = arith.constant 0 : index
    %c0_8 = arith.constant 0 : index
    %6 = vector.load %arg1[%c0_6, %c0_7, %c0_8] : memref<2x32x32xf32, #tpu.memory_space<vmem>>, vector<2x32x32xf32>
    %7 = vector.shape_cast %6 : vector<2x32x32xf32> to vector<64x32xf32>
    %cst = arith.constant dense<0.000000e+00> : vector<64xf32>
    %8 = vector.multi_reduction <add>, %7, %cst [1] : vector<64x32xf32> to vector<64xf32>
    %9 = vector.shape_cast %8 : vector<64xf32> to vector<64x1xf32>
    %cst_9 = arith.constant 3.200000e+01 : f32
    %10 = vector.broadcast %cst_9 : f32 to vector<64x1xf32>
    %11 = arith.divf %9, %10 : vector<64x1xf32>
    %12 = vector.broadcast %11 : vector<64x1xf32> to vector<64x32xf32>
    %13 = arith.subf %7, %12 : vector<64x32xf32>
    %14 = arith.mulf %13, %13 : vector<64x32xf32>
    %cst_10 = arith.constant dense<0.000000e+00> : vector<64xf32>
    %15 = vector.multi_reduction <add>, %14, %cst_10 [1] : vector<64x32xf32> to vector<64xf32>
    %16 = vector.shape_cast %15 : vector<64xf32> to vector<64x1xf32>
    %cst_11 = arith.constant 3.200000e+01 : f32
    %17 = vector.broadcast %cst_11 : f32 to vector<64x1xf32>
    %18 = arith.divf %16, %17 : vector<64x1xf32>
    %19 = vector.broadcast %11 : vector<64x1xf32> to vector<64x32xf32>
    %20 = arith.subf %7, %19 : vector<64x32xf32>
    %cst_12 = arith.constant 9.99999974E-6 : f32
    %21 = vector.broadcast %cst_12 : f32 to vector<64x1xf32>
    %22 = arith.addf %18, %21 : vector<64x1xf32>
    %23 = math.rsqrt %22 : vector<64x1xf32>
    %24 = vector.broadcast %23 : vector<64x1xf32> to vector<64x32xf32>
    %25 = arith.mulf %20, %24 : vector<64x32xf32>
    %cst_13 = arith.constant dense<0.000000e+00> : vector<64x32xf32>
    %26 = tpu.matmul %25, %0, %cst_13 {dimension_numbers = #tpu.dot_dimension_numbers<[1], [0], [0], [1], [0, 0, 1, 1], [], []>} : vector<64x32xf32>, vector<32x32xf32>, vector<64x32xf32> -> vector<64x32xf32>
    %27 = vector.broadcast %3 : vector<1x32xf32> to vector<64x32xf32>
    %28 = arith.addf %26, %27 : vector<64x32xf32>
    %cst_14 = arith.constant dense<0.000000e+00> : vector<64xf32>
    %29 = vector.multi_reduction <add>, %28, %cst_14 [1] : vector<64x32xf32> to vector<64xf32>
    %30 = vector.shape_cast %29 : vector<64xf32> to vector<64x1xf32>
    %cst_15 = arith.constant 3.200000e+01 : f32
    %31 = vector.broadcast %cst_15 : f32 to vector<64x1xf32>
    %32 = arith.divf %30, %31 : vector<64x1xf32>
    %33 = vector.broadcast %32 : vector<64x1xf32> to vector<64x32xf32>
    %34 = arith.subf %28, %33 : vector<64x32xf32>
    %35 = arith.mulf %34, %34 : vector<64x32xf32>
    %cst_16 = arith.constant dense<0.000000e+00> : vector<64xf32>
    %36 = vector.multi_reduction <add>, %35, %cst_16 [1] : vector<64x32xf32> to vector<64xf32>
    %37 = vector.shape_cast %36 : vector<64xf32> to vector<64x1xf32>
    %cst_17 = arith.constant 3.200000e+01 : f32
    %38 = vector.broadcast %cst_17 : f32 to vector<64x1xf32>
    %39 = arith.divf %37, %38 : vector<64x1xf32>
    %40 = vector.broadcast %32 : vector<64x1xf32> to vector<64x32xf32>
    %41 = arith.subf %28, %40 : vector<64x32xf32>
    %cst_18 = arith.constant 9.99999974E-6 : f32
    %42 = vector.broadcast %cst_18 : f32 to vector<64x1xf32>
    %43 = arith.addf %39, %42 : vector<64x1xf32>
    %44 = math.rsqrt %43 : vector<64x1xf32>
    %45 = vector.broadcast %44 : vector<64x1xf32> to vector<64x32xf32>
    %46 = arith.mulf %41, %45 : vector<64x32xf32>
    %cst_19 = arith.constant dense<0.000000e+00> : vector<64x96xf32>
    %47 = tpu.matmul %46, %1, %cst_19 {dimension_numbers = #tpu.dot_dimension_numbers<[1], [0], [0], [1], [0, 0, 1, 1], [], []>} : vector<64x32xf32>, vector<32x96xf32>, vector<64x96xf32> -> vector<64x96xf32>
    %48 = vector.broadcast %4 : vector<1x96xf32> to vector<64x96xf32>
    %49 = arith.addf %47, %48 : vector<64x96xf32>
    %50 = vector.extract_strided_slice %49 {offsets = [0, 0], sizes = [64, 32], strides = [1, 1]} : vector<64x96xf32> to vector<64x32xf32>
    %51 = vector.shape_cast %50 : vector<64x32xf32> to vector<2x32x32xf32>
    %52 = arith.truncf %51 : vector<2x32x32xf32> to vector<2x32x32xbf16>
    %53 = vector.extract_strided_slice %49 {offsets = [0, 32], sizes = [64, 32], strides = [1, 1]} : vector<64x96xf32> to vector<64x32xf32>
    %54 = vector.shape_cast %53 : vector<64x32xf32> to vector<2x32x32xf32>
    %55 = arith.truncf %54 : vector<2x32x32xf32> to vector<2x32x32xbf16>
    %56 = vector.extract_strided_slice %49 {offsets = [0, 64], sizes = [64, 32], strides = [1, 1]} : vector<64x96xf32> to vector<64x32xf32>
    %57 = vector.shape_cast %56 : vector<64x32xf32> to vector<2x32x32xf32>
    %58 = arith.truncf %57 : vector<2x32x32xf32> to vector<2x32x32xbf16>
    %cst_20 = arith.constant 0.000000e+00 : f32
    %59 = vector.broadcast %cst_20 : f32 to vector<64x32xf32>
    %60 = vector.extract_strided_slice %52 {offsets = [0, 0, 0], sizes = [2, 32, 8], strides = [1, 1, 1]} : vector<2x32x32xbf16> to vector<2x32x8xbf16>
    %61 = vector.extract_strided_slice %55 {offsets = [0, 0, 0], sizes = [2, 32, 8], strides = [1, 1, 1]} : vector<2x32x32xbf16> to vector<2x32x8xbf16>
    %62 = vector.extract_strided_slice %58 {offsets = [0, 0, 0], sizes = [2, 32, 8], strides = [1, 1, 1]} : vector<2x32x32xbf16> to vector<2x32x8xbf16>
    "tpu.trace_start"() <{level = 10 : i32, message = "bqd,bkd->bqk"}> : () -> ()
    %cst_21 = arith.constant dense<0.000000e+00> : vector<2x32x32xf32>
    %63 = tpu.matmul %60, %61, %cst_21 {dimension_numbers = #tpu.dot_dimension_numbers<[2], [2], [1], [1], [0, 0, 0, 1, 1, 1], [0], [0]>} : vector<2x32x8xbf16>, vector<2x32x8xbf16>, vector<2x32x32xf32> -> vector<2x32x32xf32>
    "tpu.trace_stop"() : () -> ()
    %cst_22 = arith.constant 0.353553385 : f32
    %64 = vector.broadcast %cst_22 : f32 to vector<2x32x32xf32>
    %65 = arith.mulf %63, %64 : vector<2x32x32xf32>
    %cst_23 = arith.constant dense<0xFF800000> : vector<2x32xf32>
    %66 = vector.multi_reduction <maximumf>, %65, %cst_23 [2] : vector<2x32x32xf32> to vector<2x32xf32>
    %67 = vector.shape_cast %66 : vector<2x32xf32> to vector<2x32x1xf32>
    %68 = vector.broadcast %67 : vector<2x32x1xf32> to vector<2x32x32xf32>
    %69 = arith.subf %65, %68 : vector<2x32x32xf32>
    %70 = math.exp %69 : vector<2x32x32xf32>
    %cst_24 = arith.constant dense<0.000000e+00> : vector<2x32xf32>
    %71 = vector.multi_reduction <add>, %70, %cst_24 [2] : vector<2x32x32xf32> to vector<2x32xf32>
    %72 = vector.shape_cast %71 : vector<2x32xf32> to vector<2x32x1xf32>
    %73 = arith.truncf %70 : vector<2x32x32xf32> to vector<2x32x32xbf16>
    "tpu.trace_start"() <{level = 10 : i32, message = "bqk,bkd->bqd"}> : () -> ()
    %cst_25 = arith.constant dense<0.000000e+00> : vector<2x32x8xf32>
    %74 = tpu.matmul %73, %62, %cst_25 {dimension_numbers = #tpu.dot_dimension_numbers<[2], [1], [1], [2], [0, 0, 0, 1, 1, 2], [0], [0]>} : vector<2x32x32xbf16>, vector<2x32x8xbf16>, vector<2x32x8xf32> -> vector<2x32x8xf32>
    "tpu.trace_stop"() : () -> ()
    %75 = tpu.reciprocal %72 {approx = true} : vector<2x32x1xf32> -> vector<2x32x1xf32>
    %76 = vector.broadcast %75 : vector<2x32x1xf32> to vector<2x32x8xf32>
    %77 = arith.mulf %74, %76 : vector<2x32x8xf32>
    %78 = vector.shape_cast %77 : vector<2x32x8xf32> to vector<64x8xf32>
    %79 = vector.extract_strided_slice %2 {offsets = [0, 0], sizes = [8, 32], strides = [1, 1]} : vector<32x32xf32> to vector<8x32xf32>
    %cst_26 = arith.constant dense<0.000000e+00> : vector<64x32xf32>
    %80 = tpu.matmul %78, %79, %cst_26 {dimension_numbers = #tpu.dot_dimension_numbers<[1], [0], [0], [1], [0, 0, 1, 1], [], []>} : vector<64x8xf32>, vector<8x32xf32>, vector<64x32xf32> -> vector<64x32xf32>
    %81 = arith.addf %59, %80 : vector<64x32xf32>
    %82 = vector.extract_strided_slice %52 {offsets = [0, 0, 8], sizes = [2, 32, 8], strides = [1, 1, 1]} : vector<2x32x32xbf16> to vector<2x32x8xbf16>
    %83 = vector.extract_strided_slice %55 {offsets = [0, 0, 8], sizes = [2, 32, 8], strides = [1, 1, 1]} : vector<2x32x32xbf16> to vector<2x32x8xbf16>
    %84 = vector.extract_strided_slice %58 {offsets = [0, 0, 8], sizes = [2, 32, 8], strides = [1, 1, 1]} : vector<2x32x32xbf16> to vector<2x32x8xbf16>
    "tpu.trace_start"() <{level = 10 : i32, message = "bqd,bkd->bqk"}> : () -> ()
    %cst_27 = arith.constant dense<0.000000e+00> : vector<2x32x32xf32>
    %85 = tpu.matmul %82, %83, %cst_27 {dimension_numbers = #tpu.dot_dimension_numbers<[2], [2], [1], [1], [0, 0, 0, 1, 1, 1], [0], [0]>} : vector<2x32x8xbf16>, vector<2x32x8xbf16>, vector<2x32x32xf32> -> vector<2x32x32xf32>
    "tpu.trace_stop"() : () -> ()
    %cst_28 = arith.constant 0.353553385 : f32
    %86 = vector.broadcast %cst_28 : f32 to vector<2x32x32xf32>
    %87 = arith.mulf %85, %86 : vector<2x32x32xf32>
    %cst_29 = arith.constant dense<0xFF800000> : vector<2x32xf32>
    %88 = vector.multi_reduction <maximumf>, %87, %cst_29 [2] : vector<2x32x32xf32> to vector<2x32xf32>
    %89 = vector.shape_cast %88 : vector<2x32xf32> to vector<2x32x1xf32>
    %90 = vector.broadcast %89 : vector<2x32x1xf32> to vector<2x32x32xf32>
    %91 = arith.subf %87, %90 : vector<2x32x32xf32>
    %92 = math.exp %91 : vector<2x32x32xf32>
    %cst_30 = arith.constant dense<0.000000e+00> : vector<2x32xf32>
    %93 = vector.multi_reduction <add>, %92, %cst_30 [2] : vector<2x32x32xf32> to vector<2x32xf32>
    %94 = vector.shape_cast %93 : vector<2x32xf32> to vector<2x32x1xf32>
    %95 = arith.truncf %92 : vector<2x32x32xf32> to vector<2x32x32xbf16>
    "tpu.trace_start"() <{level = 10 : i32, message = "bqk,bkd->bqd"}> : () -> ()
    %cst_31 = arith.constant dense<0.000000e+00> : vector<2x32x8xf32>
    %96 = tpu.matmul %95, %84, %cst_31 {dimension_numbers = #tpu.dot_dimension_numbers<[2], [1], [1], [2], [0, 0, 0, 1, 1, 2], [0], [0]>} : vector<2x32x32xbf16>, vector<2x32x8xbf16>, vector<2x32x8xf32> -> vector<2x32x8xf32>
    "tpu.trace_stop"() : () -> ()
    %97 = tpu.reciprocal %94 {approx = true} : vector<2x32x1xf32> -> vector<2x32x1xf32>
    %98 = vector.broadcast %97 : vector<2x32x1xf32> to vector<2x32x8xf32>
    %99 = arith.mulf %96, %98 : vector<2x32x8xf32>
    %100 = vector.shape_cast %99 : vector<2x32x8xf32> to vector<64x8xf32>
    %101 = vector.extract_strided_slice %2 {offsets = [8, 0], sizes = [8, 32], strides = [1, 1]} : vector<32x32xf32> to vector<8x32xf32>
    %cst_32 = arith.constant dense<0.000000e+00> : vector<64x32xf32>
    %102 = tpu.matmul %100, %101, %cst_32 {dimension_numbers = #tpu.dot_dimension_numbers<[1], [0], [0], [1], [0, 0, 1, 1], [], []>} : vector<64x8xf32>, vector<8x32xf32>, vector<64x32xf32> -> vector<64x32xf32>
    %103 = arith.addf %81, %102 : vector<64x32xf32>
    %104 = vector.extract_strided_slice %52 {offsets = [0, 0, 16], sizes = [2, 32, 8], strides = [1, 1, 1]} : vector<2x32x32xbf16> to vector<2x32x8xbf16>
    %105 = vector.extract_strided_slice %55 {offsets = [0, 0, 16], sizes = [2, 32, 8], strides = [1, 1, 1]} : vector<2x32x32xbf16> to vector<2x32x8xbf16>
    %106 = vector.extract_strided_slice %58 {offsets = [0, 0, 16], sizes = [2, 32, 8], strides = [1, 1, 1]} : vector<2x32x32xbf16> to vector<2x32x8xbf16>
    "tpu.trace_start"() <{level = 10 : i32, message = "bqd,bkd->bqk"}> : () -> ()
    %cst_33 = arith.constant dense<0.000000e+00> : vector<2x32x32xf32>
    %107 = tpu.matmul %104, %105, %cst_33 {dimension_numbers = #tpu.dot_dimension_numbers<[2], [2], [1], [1], [0, 0, 0, 1, 1, 1], [0], [0]>} : vector<2x32x8xbf16>, vector<2x32x8xbf16>, vector<2x32x32xf32> -> vector<2x32x32xf32>
    "tpu.trace_stop"() : () -> ()
    %cst_34 = arith.constant 0.353553385 : f32
    %108 = vector.broadcast %cst_34 : f32 to vector<2x32x32xf32>
    %109 = arith.mulf %107, %108 : vector<2x32x32xf32>
    %cst_35 = arith.constant dense<0xFF800000> : vector<2x32xf32>
    %110 = vector.multi_reduction <maximumf>, %109, %cst_35 [2] : vector<2x32x32xf32> to vector<2x32xf32>
    %111 = vector.shape_cast %110 : vector<2x32xf32> to vector<2x32x1xf32>
    %112 = vector.broadcast %111 : vector<2x32x1xf32> to vector<2x32x32xf32>
    %113 = arith.subf %109, %112 : vector<2x32x32xf32>
    %114 = math.exp %113 : vector<2x32x32xf32>
    %cst_36 = arith.constant dense<0.000000e+00> : vector<2x32xf32>
    %115 = vector.multi_reduction <add>, %114, %cst_36 [2] : vector<2x32x32xf32> to vector<2x32xf32>
    %116 = vector.shape_cast %115 : vector<2x32xf32> to vector<2x32x1xf32>
    %117 = arith.truncf %114 : vector<2x32x32xf32> to vector<2x32x32xbf16>
    "tpu.trace_start"() <{level = 10 : i32, message = "bqk,bkd->bqd"}> : () -> ()
    %cst_37 = arith.constant dense<0.000000e+00> : vector<2x32x8xf32>
    %118 = tpu.matmul %117, %106, %cst_37 {dimension_numbers = #tpu.dot_dimension_numbers<[2], [1], [1], [2], [0, 0, 0, 1, 1, 2], [0], [0]>} : vector<2x32x32xbf16>, vector<2x32x8xbf16>, vector<2x32x8xf32> -> vector<2x32x8xf32>
    "tpu.trace_stop"() : () -> ()
    %119 = tpu.reciprocal %116 {approx = true} : vector<2x32x1xf32> -> vector<2x32x1xf32>
    %120 = vector.broadcast %119 : vector<2x32x1xf32> to vector<2x32x8xf32>
    %121 = arith.mulf %118, %120 : vector<2x32x8xf32>
    %122 = vector.shape_cast %121 : vector<2x32x8xf32> to vector<64x8xf32>
    %123 = vector.extract_strided_slice %2 {offsets = [16, 0], sizes = [8, 32], strides = [1, 1]} : vector<32x32xf32> to vector<8x32xf32>
    %cst_38 = arith.constant dense<0.000000e+00> : vector<64x32xf32>
    %124 = tpu.matmul %122, %123, %cst_38 {dimension_numbers = #tpu.dot_dimension_numbers<[1], [0], [0], [1], [0, 0, 1, 1], [], []>} : vector<64x8xf32>, vector<8x32xf32>, vector<64x32xf32> -> vector<64x32xf32>
    %125 = arith.addf %103, %124 : vector<64x32xf32>
    %126 = vector.extract_strided_slice %52 {offsets = [0, 0, 24], sizes = [2, 32, 8], strides = [1, 1, 1]} : vector<2x32x32xbf16> to vector<2x32x8xbf16>
    %127 = vector.extract_strided_slice %55 {offsets = [0, 0, 24], sizes = [2, 32, 8], strides = [1, 1, 1]} : vector<2x32x32xbf16> to vector<2x32x8xbf16>
    %128 = vector.extract_strided_slice %58 {offsets = [0, 0, 24], sizes = [2, 32, 8], strides = [1, 1, 1]} : vector<2x32x32xbf16> to vector<2x32x8xbf16>
    "tpu.trace_start"() <{level = 10 : i32, message = "bqd,bkd->bqk"}> : () -> ()
    %cst_39 = arith.constant dense<0.000000e+00> : vector<2x32x32xf32>
    %129 = tpu.matmul %126, %127, %cst_39 {dimension_numbers = #tpu.dot_dimension_numbers<[2], [2], [1], [1], [0, 0, 0, 1, 1, 1], [0], [0]>} : vector<2x32x8xbf16>, vector<2x32x8xbf16>, vector<2x32x32xf32> -> vector<2x32x32xf32>
    "tpu.trace_stop"() : () -> ()
    %cst_40 = arith.constant 0.353553385 : f32
    %130 = vector.broadcast %cst_40 : f32 to vector<2x32x32xf32>
    %131 = arith.mulf %129, %130 : vector<2x32x32xf32>
    %cst_41 = arith.constant dense<0xFF800000> : vector<2x32xf32>
    %132 = vector.multi_reduction <maximumf>, %131, %cst_41 [2] : vector<2x32x32xf32> to vector<2x32xf32>
    %133 = vector.shape_cast %132 : vector<2x32xf32> to vector<2x32x1xf32>
    %134 = vector.broadcast %133 : vector<2x32x1xf32> to vector<2x32x32xf32>
    %135 = arith.subf %131, %134 : vector<2x32x32xf32>
    %136 = math.exp %135 : vector<2x32x32xf32>
    %cst_42 = arith.constant dense<0.000000e+00> : vector<2x32xf32>
    %137 = vector.multi_reduction <add>, %136, %cst_42 [2] : vector<2x32x32xf32> to vector<2x32xf32>
    %138 = vector.shape_cast %137 : vector<2x32xf32> to vector<2x32x1xf32>
    %139 = arith.truncf %136 : vector<2x32x32xf32> to vector<2x32x32xbf16>
    "tpu.trace_start"() <{level = 10 : i32, message = "bqk,bkd->bqd"}> : () -> ()
    %cst_43 = arith.constant dense<0.000000e+00> : vector<2x32x8xf32>
    %140 = tpu.matmul %139, %128, %cst_43 {dimension_numbers = #tpu.dot_dimension_numbers<[2], [1], [1], [2], [0, 0, 0, 1, 1, 2], [0], [0]>} : vector<2x32x32xbf16>, vector<2x32x8xbf16>, vector<2x32x8xf32> -> vector<2x32x8xf32>
    "tpu.trace_stop"() : () -> ()
    %141 = tpu.reciprocal %138 {approx = true} : vector<2x32x1xf32> -> vector<2x32x1xf32>
    %142 = vector.broadcast %141 : vector<2x32x1xf32> to vector<2x32x8xf32>
    %143 = arith.mulf %140, %142 : vector<2x32x8xf32>
    %144 = vector.shape_cast %143 : vector<2x32x8xf32> to vector<64x8xf32>
    %145 = vector.extract_strided_slice %2 {offsets = [24, 0], sizes = [8, 32], strides = [1, 1]} : vector<32x32xf32> to vector<8x32xf32>
    %cst_44 = arith.constant dense<0.000000e+00> : vector<64x32xf32>
    %146 = tpu.matmul %144, %145, %cst_44 {dimension_numbers = #tpu.dot_dimension_numbers<[1], [0], [0], [1], [0, 0, 1, 1], [], []>} : vector<64x8xf32>, vector<8x32xf32>, vector<64x32xf32> -> vector<64x32xf32>
    %147 = arith.addf %125, %146 : vector<64x32xf32>
    %148 = vector.broadcast %5 : vector<1x32xf32> to vector<64x32xf32>
    %149 = arith.addf %147, %148 : vector<64x32xf32>
    %150 = arith.addf %149, %7 : vector<64x32xf32>
    %151 = vector.shape_cast %150 : vector<64x32xf32> to vector<2x32x32xf32>
    %c0_45 = arith.constant 0 : index
    %c0_46 = arith.constant 0 : index
    %c0_47 = arith.constant 0 : index
    %152 = vector.load %arg3[%c0_45, %c0_46, %c0_47] : memref<2x32x32xf32, #tpu.memory_space<vmem>>, vector<2x32x32xf32>
    tpu.vector_store %arg3[%c0_45, %c0_46, %c0_47], %151 {strides = array<i32>} : memref<2x32x32xf32, #tpu.memory_space<vmem>>, vector<2x32x32xf32>,
    return
  }
  func.func @transform_0(%arg0: i32) -> (i32, i32, i32) {
    %c0_i32 = arith.constant 0 : i32
    %c0_i32_0 = arith.constant 0 : i32
    %c0_i32_1 = arith.constant 0 : i32
    return %arg0, %c0_i32, %c0_i32_0 : i32, i32, i32
  }
  func.func @transform_1(%arg0: i32) -> (i32, i32) {
    %c0_i32 = arith.constant 0 : i32
    %c0_i32_0 = arith.constant 0 : i32
    %c0_i32_1 = arith.constant 0 : i32
    return %c0_i32, %c0_i32_0 : i32, i32
  }
  func.func @transform_2(%arg0: i32) -> (i32, i32, i32) {
    %c0_i32 = arith.constant 0 : i32
    %c0_i32_0 = arith.constant 0 : i32
    %c0_i32_1 = arith.constant 0 : i32
    return %arg0, %c0_i32, %c0_i32_0 : i32, i32, i32
  }
}

</mosaic_0001>

<bundles_post_ra>
// kernel: tpu_custom_call.1
= control target key start
LH: loop header
LB: loop body
LE: loop exit
PB: predicated region body
PF: predicated region fallthrough
CT: control target
= control target key end

     0   :  { %vm36_vm0 = vcmask 261120   ;;  %s3845_s0 = inlined_call_operand.vmem [shape: f32[2,32,32], index: 0, kind: input, shape index: {}]   ;;  %s3846_s1 = inlined_call_operand.vmem [shape: f32[120,96], index: 1, kind: input, shape index: {}]   ;;  %s3847_s2 = inlined_call_operand.hbm [shape: f32[2,32,32], index: 2, kind: output, shape index: {}]  }
   0x1   :  { %v28_v0 = vld [vmem:[%s3845_s0] sm:$0xff]  ;;  %v30_v1 = vld [vmem:[%s3845_s0 + $0x10] sm:$0xff]  ;;  %v29_v2 = vld [vmem:[%s3845_s0 + $0x8] sm:$0xff] }
   0x2   :  { %v37_v3 = vsel %vm36_vm0, %v28_v0, 0.0  ;;  %v43_v4 = vsel %vm36_vm0, %v30_v1, 0.0  ;;  %v31_v5 = vld [vmem:[%s3845_s0 + $0x18] sm:$0xff]  ;;  %v40_v6 = vsel %vm36_vm0, %v29_v2, 0.0 }
   0x3   :  { %38 = vadd.xlane.f32.xlu0 %v37_v3  ;;  %44 = vadd.xlane.f32.xlu1 %v43_v4  ;;  %v46_v7 = vsel %vm36_vm0, %v31_v5, 0.0 }
   0x4   :  { %7 = vsyncpa [#allocation3], 0  ;;  %v32_v8 = vld [vmem:[%s3845_s0 + $0x20] sm:$0xff]  ;;  %v33_v9 = vld [vmem:[%s3845_s0 + $0x28] sm:$0xff]  ;;  %vm522_vm1 = vcmask 64512   ;;  %s3222_s17 = smov 96  }
   0x5   :  { %v49_v10 = vsel %vm36_vm0, %v32_v8, 0.0  ;;  %v52_v11 = vsel %vm36_vm0, %v33_v9, 0.0  ;;  %v34_v12 = vld [vmem:[%s3845_s0 + $0x30] sm:$0xff]  ;;  %v35_v13 = vld [vmem:[%s3845_s0 + $0x38] sm:$0xff]  ;;  %v13_v56 = vld [vmem:[%s3846_s1] sm:$0xff]  ;;  %s3223_s18 = smov 64  }
   0x6   :  { %v55_v14 = vsel %vm36_vm0, %v34_v12, 0.0  ;;  %v58_v15 = vsel %vm36_vm0, %v35_v13, 0.0  ;;  %v14_v57 = vld [vmem:[%s3846_s1 + $0x8] sm:$0xff]  ;;  %v15_v59 = vld [vmem:[%s3846_s1 + $0x10] sm:$0xff]  ;;  %v16_v60 = vld [vmem:[%s3846_s1 + $0x18] sm:$0xff]  ;;  %s3224_s19 = smov 88  }
   0x7   :  { %41 = vadd.xlane.f32.xlu0 %v40_v6  ;;  %47 = vadd.xlane.f32.xlu1 %v46_v7  ;;  %v2960_v58 = vpack.c.bf16 %v14_v57, %v13_v56  ;;  %v2964_v61 = vpack.c.bf16 %v16_v60, %v15_v59  ;;  %s3225_s20 = smov 120   ;;  %s3226_s21 = smov 56  }
   0x8   :  { %s3227_s22 = smov 80   ;;  %s3228_s23 = smov 112  }
   0x9   :  { %2961 = vmatprep.subr.bf16.mxu0 %v2960_v58  ;;  %s3229_s28 = smov 48   ;;  %s3230_s29 = smov 72  }
   0xa   :  { %2963 = vmatpush3.bf16.msra.mxu0 %v2960_v58  ;;  %s3231_s30 = smov 104   ;;  %s3232_s5 = smov 40  }
   0xb   :  { %50 = vadd.xlane.f32.xlu0 %v49_v10  ;;  %53 = vadd.xlane.f32.xlu1 %v52_v11 }
   0xc   :  { %2965 = vmatprep.subr.bf16.mxu0 %v2964_v61 }
   0xe   :  { %2967 = vmatpush3.bf16.msra.mxu0 %v2964_v61 }
   0xf   :  { %56 = vadd.xlane.f32.xlu0 %v55_v14  ;;  %59 = vadd.xlane.f32.xlu1 %v58_v15 }
  0x90   :  { %v39_v16 = vpop.xlane.xlu0 %38  ;;  %v45_v17 = vpop.xlane.xlu1 %44 }
  0x91   :  { %v62_v18 = vmul.f32 0.03125, %v39_v16  ;;  %v64_v19 = vmul.f32 0.03125, %v45_v17 }
  0x93   :  { %v3283_v20 = vsub.f32 %v28_v0, %v62_v18  ;;  %v3285_v21 = vsub.f32 %v30_v1, %v64_v19 }
  0x94   :  { %v42_v22 = vpop.xlane.xlu0 %41  ;;  %v48_v23 = vpop.xlane.xlu1 %47 }
  0x95   :  { %v63_v24 = vmul.f32 0.03125, %v42_v22  ;;  %v65_v25 = vmul.f32 0.03125, %v48_v23  ;;  %v78_v26 = vmul.f32 %v3283_v20, %v3283_v20  ;;  %v80_v27 = vmul.f32 %v3285_v21, %v3285_v21 }
  0x97   :  { %v3291_v28 = vsub.f32 %v29_v2, %v63_v24  ;;  %v3293_v29 = vsub.f32 %v31_v5, %v65_v25  ;;  %v86_v30 = vsel %vm36_vm0, %v78_v26, 0.0  ;;  %v92_v33 = vsel %vm36_vm0, %v80_v27, 0.0 }
  0x98   :  { %87 = vadd.xlane.f32.xlu0 %v86_v30  ;;  %v51_v31 = vpop.xlane.xlu0 %50  ;;  %v54_v32 = vpop.xlane.xlu1 %53 }
  0x99   :  { %v66_v34 = vmul.f32 0.03125, %v51_v31  ;;  %v67_v35 = vmul.f32 0.03125, %v54_v32  ;;  %v79_v36 = vmul.f32 %v3291_v28, %v3291_v28  ;;  %v81_v37 = vmul.f32 %v3293_v29, %v3293_v29 }
  0x9b   :  { %v3301_v38 = vsub.f32 %v32_v8, %v66_v34  ;;  %v3303_v39 = vsub.f32 %v33_v9, %v67_v35  ;;  %v89_v40 = vsel %vm36_vm0, %v79_v36, 0.0  ;;  %v95_v43 = vsel %vm36_vm0, %v81_v37, 0.0 }
  0x9c   :  { %93 = vadd.xlane.f32.xlu0 %v92_v33  ;;  %90 = vadd.xlane.f32.xlu1 %v89_v40  ;;  %v57_v41 = vpop.xlane.xlu0 %56  ;;  %v60_v42 = vpop.xlane.xlu1 %59 }
  0x9d   :  { %v68_v44 = vmul.f32 0.03125, %v57_v41  ;;  %v69_v45 = vmul.f32 0.03125, %v60_v42  ;;  %v82_v46 = vmul.f32 %v3301_v38, %v3301_v38  ;;  %v83_v47 = vmul.f32 %v3303_v39, %v3303_v39 }
  0x9f   :  { %v3311_v48 = vsub.f32 %v34_v12, %v68_v44  ;;  %v3313_v49 = vsub.f32 %v35_v13, %v69_v45  ;;  %v98_v50 = vsel %vm36_vm0, %v82_v46, 0.0  ;;  %v101_v51 = vsel %vm36_vm0, %v83_v47, 0.0 }
  0xa0   :  { %96 = vadd.xlane.f32.xlu1 %v95_v43  ;;  %99 = vadd.xlane.f32.xlu0 %v98_v50 }
  0xa1   :  { %v84_v52 = vmul.f32 %v3311_v48, %v3311_v48  ;;  %v85_v53 = vmul.f32 %v3313_v49, %v3313_v49 }
  0xa3   :  { %v104_v54 = vsel %vm36_vm0, %v84_v52, 0.0  ;;  %v107_v55 = vsel %vm36_vm0, %v85_v53, 0.0 }
  0xa4   :  { %102 = vadd.xlane.f32.xlu1 %v101_v51  ;;  %105 = vadd.xlane.f32.xlu0 %v104_v54 }
  0xa8   :  { %108 = vadd.xlane.f32.xlu1 %v107_v55 }
 0x125   :  { %v88_v62 = vpop.xlane.xlu0 %87 }
 0x126   :  { %v110_v63 = vmul.f32 0.03125, %v88_v62 }
 0x128   :  { %v118_v0 = vadd.f32 1e-05, %v110_v63 }
 0x129   :  { %v91_v1 = vpop.xlane.xlu1 %90  ;;  %v94_v2 = vpop.xlane.xlu0 %93 }
 0x12a   :  { %3030 = vrsqrt.f32 %v118_v0  ;;  %v111_v3 = vmul.f32 0.03125, %v91_v1  ;;  %v112_v4 = vmul.f32 0.03125, %v94_v2 }
 0x12c   :  { %v119_v5 = vadd.f32 1e-05, %v111_v3  ;;  %v120_v6 = vadd.f32 1e-05, %v112_v4 }
 0x12d   :  { %v97_v7 = vpop.xlane.xlu1 %96  ;;  %v100_v8 = vpop.xlane.xlu0 %99 }
 0x12e   :  { %3032 = vrsqrt.f32 %v119_v5  ;;  %v113_v9 = vmul.f32 0.03125, %v97_v7  ;;  %v114_v10 = vmul.f32 0.03125, %v100_v8 }
 0x12f   :  { %3034 = vrsqrt.f32 %v120_v6 }
 0x130   :  { %v121_v11 = vadd.f32 1e-05, %v113_v9  ;;  %v122_v12 = vadd.f32 1e-05, %v114_v10 }
 0x131   :  { %v103_v13 = vpop.xlane.xlu1 %102  ;;  %v106_v14 = vpop.xlane.xlu0 %105 }
 0x132   :  { %3036 = vrsqrt.f32 %v121_v11  ;;  %v115_v15 = vmul.f32 0.03125, %v103_v13  ;;  %v116_v16 = vmul.f32 0.03125, %v106_v14 }
 0x133   :  { %3038 = vrsqrt.f32 %v122_v12 }
 0x134   :  { %v3031_v17 = vpop.eup %3030  ;;  %v123_v18 = vadd.f32 1e-05, %v115_v15  ;;  %v124_v19 = vadd.f32 1e-05, %v116_v16 }
 0x135   :  { %v109_v22 = vpop.xlane.xlu1 %108  ;;  %v134_v23 = vmul.f32 %v3031_v17, %v3283_v20 }
 0x136   :  { %3040 = vrsqrt.f32 %v123_v18  ;;  %v117_v24 = vmul.f32 0.03125, %v109_v22 }
 0x137   :  { %3042 = vrsqrt.f32 %v124_v19  ;;  %2744 = vmatprep.mubr.msk.f32.mxu0 %vm36_vm0, %v134_v23 }
 0x138   :  { %v3033_v25 = vpop.eup %3032  ;;  %v125_v26 = vadd.f32 1e-05, %v117_v24 }
 0x139   :  { %v3035_v27 = vpop.eup %3034  ;;  %v135_v30 = vmul.f32 %v3033_v25, %v3291_v28 }
 0x13a   :  { %3044 = vrsqrt.f32 %v125_v26  ;;  %v136_v31 = vmul.f32 %v3035_v27, %v3285_v21 }
 0x13b   :  { %2745 = vmatmul.mubr.msk.f32.vlgmr.msra.gmra.mrb[0].mxu0 %vm36_vm0, %v135_v30 }
 0x13c   :  { %v3037_v32 = vpop.eup %3036  ;;  %2747 = vmatprep.mubr.msk.f32.mxu0 %vm36_vm0, %v136_v31 }
 0x13d   :  { %v3039_v33 = vpop.eup %3038  ;;  %v137_v20 = vmul.f32 %v3037_v32, %v3293_v29  ;;  %v2529_v29 = vld [vmem:[%s3846_s1 + $0x60] ss:$0 sm:$0xff] }
 0x13e   :  { %v138_v34 = vmul.f32 %v3039_v33, %v3301_v38 }
 0x13f   :  { %2748 = vmatmul.mubr.msk.f32.gmra.mrb[2].mxu0 %vm36_vm0, %v137_v20 }
 0x140   :  { %v3041_v35 = vpop.eup %3040  ;;  %2750 = vmatprep.mubr.msk.f32.mxu0 %vm36_vm0, %v138_v34 }
 0x141   :  { %v3043_v36 = vpop.eup %3042  ;;  %v139_v28 = vmul.f32 %v3041_v35, %v3303_v39 }
 0x142   :  { %v140_v21 = vmul.f32 %v3043_v36, %v3311_v48 }
 0x143   :  { %2751 = vmatmul.mubr.msk.f32.gmra.mrb[4].mxu0 %vm36_vm0, %v139_v28 }
 0x144   :  { %v3045_v37 = vpop.eup %3044  ;;  %2753 = vmatprep.mubr.msk.f32.mxu0 %vm36_vm0, %v140_v21 }
 0x145   :  { %v141_v40 = vmul.f32 %v3045_v37, %v3313_v49 }
 0x147   :  { %2754 = vmatmul.mubr.msk.f32.gmra.mrb[6].mxu0 %vm36_vm0, %v141_v40 }
 0x20e   :  { %v2746_v38 = vpop.f32.mrb[0].mxu0 }
 0x20f   :  { %v242_v41 = vadd.f32 %v2746_v38, %v2529_v29  ;;  %v236_v42 = vpop.f32.mrb[1].mxu0  ;;  %v17_v38 = vld [vmem:[%s3846_s1 + $0x20] sm:$0xff] }
 0x210   :  { %v237_v43 = vadd.f32 %v2529_v29, %v236_v42 }
 0x211   :  { %v278_v39 = vsel %vm36_vm0, %v242_v41, 0.0 }
 0x212   :  { %279 = vadd.xlane.f32.xlu1 %v278_v39  ;;  %v2749_v44 = vpop.f32.mrb[2].mxu0  ;;  %v275_v45 = vsel %vm36_vm0, %v237_v43, 0.0  ;;  %v20_v39 = vld [vmem:[%s3846_s1 + $0x38] sm:$0xff] }
 0x213   :  { %v252_v46 = vadd.f32 %v2749_v44, %v2529_v29  ;;  %v246_v47 = vpop.f32.mrb[3].mxu0  ;;  %276 = vadd.xlane.f32.xlu0 %v275_v45 }
 0x214   :  { %v247_v48 = vadd.f32 %v2529_v29, %v246_v47 }
 0x215   :  { %v284_v49 = vsel %vm36_vm0, %v252_v46, 0.0 }
 0x216   :  { %285 = vadd.xlane.f32.xlu1 %v284_v49  ;;  %v2752_v50 = vpop.f32.mrb[4].mxu0  ;;  %v281_v51 = vsel %vm36_vm0, %v247_v48, 0.0 }
 0x217   :  { %v262_v52 = vadd.f32 %v2752_v50, %v2529_v29  ;;  %v256_v53 = vpop.f32.mrb[5].mxu0  ;;  %282 = vadd.xlane.f32.xlu0 %v281_v51 }
 0x218   :  { %v257_v54 = vadd.f32 %v2529_v29, %v256_v53 }
 0x219   :  { %v290_v55 = vsel %vm36_vm0, %v262_v52, 0.0 }
 0x21a   :  { %291 = vadd.xlane.f32.xlu1 %v290_v55  ;;  %v2755_v56 = vpop.f32.mrb[6].mxu0  ;;  %v287_v57 = vsel %vm36_vm0, %v257_v54, 0.0 }
 0x21b   :  { %v272_v58 = vadd.f32 %v2755_v56, %v2529_v29  ;;  %v266_v59 = vpop.f32.mrb[7].mxu0  ;;  %288 = vadd.xlane.f32.xlu0 %v287_v57 }
 0x21c   :  { %v267_v60 = vadd.f32 %v2529_v29, %v266_v59 }
 0x21d   :  { %v296_v61 = vsel %vm36_vm0, %v272_v58, 0.0 }
 0x21e   :  { %297 = vadd.xlane.f32.xlu1 %v296_v61  ;;  %v293_v62 = vsel %vm36_vm0, %v267_v60, 0.0 }
 0x21f   :  { %294 = vadd.xlane.f32.xlu0 %v293_v62 }
 0x29f   :  { %v280_v63 = vpop.xlane.xlu1 %279 }
 0x2a0   :  { %v300_v0 = vmul.f32 0.03125, %v280_v63  ;;  %v277_v1 = vpop.xlane.xlu0 %276 }
 0x2a1   :  { %v299_v2 = vmul.f32 0.03125, %v277_v1 }
 0x2a2   :  { %v3362_v3 = vsub.f32 %v242_v41, %v300_v0  ;;  %v18_v41 = vld [vmem:[%s3846_s1 + $0x28] sm:$0xff] }
 0x2a3   :  { %v3364_v4 = vsub.f32 %v237_v43, %v299_v2  ;;  %v286_v5 = vpop.xlane.xlu1 %285  ;;  %v2968_v42 = vpack.c.bf16 %v18_v41, %v17_v38  ;;  %v19_v43 = vld [vmem:[%s3846_s1 + $0x30] sm:$0xff] }
 0x2a4   :  { %v302_v6 = vmul.f32 0.03125, %v286_v5  ;;  %v283_v7 = vpop.xlane.xlu0 %282  ;;  %v316_v8 = vmul.f32 %v3362_v3, %v3362_v3  ;;  %v2972_v44 = vpack.c.bf16 %v20_v39, %v19_v43 }
 0x2a5   :  { %v301_v9 = vmul.f32 0.03125, %v283_v7  ;;  %v315_v10 = vmul.f32 %v3364_v4, %v3364_v4  ;;  %2969 = vmatprep.subr.bf16.mxu1 %v2968_v42 }
 0x2a6   :  { %v3370_v11 = vsub.f32 %v252_v46, %v302_v6  ;;  %v326_v12 = vsel %vm36_vm0, %v316_v8, 0.0  ;;  %2971 = vmatpush3.bf16.msra.mxu1 %v2968_v42 }
 0x2a7   :  { %v3373_v13 = vsub.f32 %v247_v48, %v301_v9  ;;  %v292_v14 = vpop.xlane.xlu1 %291  ;;  %327 = vadd.xlane.f32.xlu1 %v326_v12  ;;  %v323_v15 = vsel %vm36_vm0, %v315_v10, 0.0  ;;  %2973 = vmatprep.subr.bf16.mxu1 %v2972_v44 }
 0x2a8   :  { %v304_v16 = vmul.f32 0.03125, %v292_v14  ;;  %324 = vadd.xlane.f32.xlu0 %v323_v15  ;;  %v289_v17 = vpop.xlane.xlu0 %288  ;;  %v318_v18 = vmul.f32 %v3370_v11, %v3370_v11 }
 0x2a9   :  { %v303_v19 = vmul.f32 0.03125, %v289_v17  ;;  %v317_v22 = vmul.f32 %v3373_v13, %v3373_v13 }
 0x2aa   :  { %v3380_v23 = vsub.f32 %v262_v52, %v304_v16  ;;  %v332_v24 = vsel %vm36_vm0, %v318_v18, 0.0  ;;  %2975 = vmatpush3.bf16.msra.mxu1 %v2972_v44 }
 0x2ab   :  { %v3383_v25 = vsub.f32 %v257_v54, %v303_v19  ;;  %333 = vadd.xlane.f32.xlu1 %v332_v24  ;;  %v298_v26 = vpop.xlane.xlu1 %297  ;;  %v329_v27 = vsel %vm36_vm0, %v317_v22, 0.0  ;;  %v2538_v24 = vld [vmem:[%s3846_s1 + $0x68] ss:$0 sm:$0xff] }
 0x2ac   :  { %v306_v30 = vmul.f32 0.03125, %v298_v26  ;;  %330 = vadd.xlane.f32.xlu0 %v329_v27  ;;  %v295_v31 = vpop.xlane.xlu0 %294  ;;  %v320_v32 = vmul.f32 %v3380_v23, %v3380_v23 }
 0x2ad   :  { %v305_v33 = vmul.f32 0.03125, %v295_v31  ;;  %v319_v20 = vmul.f32 %v3383_v25, %v3383_v25 }
 0x2ae   :  { %v3390_v34 = vsub.f32 %v272_v58, %v306_v30  ;;  %v338_v35 = vsel %vm36_vm0, %v320_v32, 0.0 }
 0x2af   :  { %v3393_v36 = vsub.f32 %v267_v60, %v305_v33  ;;  %339 = vadd.xlane.f32.xlu1 %v338_v35  ;;  %v335_v28 = vsel %vm36_vm0, %v319_v20, 0.0 }
 0x2b0   :  { %336 = vadd.xlane.f32.xlu0 %v335_v28  ;;  %v322_v21 = vmul.f32 %v3390_v34, %v3390_v34 }
 0x2b1   :  { %v321_v37 = vmul.f32 %v3393_v36, %v3393_v36 }
 0x2b2   :  { %v344_v40 = vsel %vm36_vm0, %v322_v21, 0.0 }
 0x2b3   :  { %345 = vadd.xlane.f32.xlu1 %v344_v40  ;;  %v341_v29 = vsel %vm36_vm0, %v321_v37, 0.0 }
 0x2b4   :  { %342 = vadd.xlane.f32.xlu0 %v341_v29 }
 0x334   :  { %v328_v45 = vpop.xlane.xlu1 %327 }
 0x335   :  { %v348_v46 = vmul.f32 0.03125, %v328_v45  ;;  %v325_v47 = vpop.xlane.xlu0 %324 }
 0x336   :  { %v347_v48 = vmul.f32 0.03125, %v325_v47 }
 0x337   :  { %v356_v49 = vadd.f32 1e-05, %v348_v46 }
 0x338   :  { %v355_v50 = vadd.f32 1e-05, %v347_v48  ;;  %v334_v51 = vpop.xlane.xlu1 %333 }
 0x339   :  { %3046 = vrsqrt.f32 %v356_v49  ;;  %v350_v52 = vmul.f32 0.03125, %v334_v51  ;;  %v331_v53 = vpop.xlane.xlu0 %330 }
 0x33a   :  { %3048 = vrsqrt.f32 %v355_v50  ;;  %v349_v54 = vmul.f32 0.03125, %v331_v53 }
 0x33b   :  { %v358_v55 = vadd.f32 1e-05, %v350_v52 }
 0x33c   :  { %v357_v56 = vadd.f32 1e-05, %v349_v54  ;;  %v340_v57 = vpop.xlane.xlu1 %339 }
 0x33d   :  { %3050 = vrsqrt.f32 %v358_v55  ;;  %v352_v58 = vmul.f32 0.03125, %v340_v57  ;;  %v337_v59 = vpop.xlane.xlu0 %336 }
 0x33e   :  { %3052 = vrsqrt.f32 %v357_v56  ;;  %v351_v60 = vmul.f32 0.03125, %v337_v59 }
 0x33f   :  { %v360_v61 = vadd.f32 1e-05, %v352_v58 }
 0x340   :  { %v359_v62 = vadd.f32 1e-05, %v351_v60  ;;  %v346_v63 = vpop.xlane.xlu1 %345 }
 0x341   :  { %3054 = vrsqrt.f32 %v360_v61  ;;  %v354_v0 = vmul.f32 0.03125, %v346_v63  ;;  %v343_v1 = vpop.xlane.xlu0 %342 }
 0x342   :  { %3056 = vrsqrt.f32 %v359_v62  ;;  %v353_v2 = vmul.f32 0.03125, %v343_v1 }
 0x343   :  { %v3047_v5 = vpop.eup %3046  ;;  %v362_v6 = vadd.f32 1e-05, %v354_v0 }
 0x344   :  { %v3049_v7 = vpop.eup %3048  ;;  %v361_v8 = vadd.f32 1e-05, %v353_v2  ;;  %v372_v10 = vmul.f32 %v3047_v5, %v3362_v3 }
 0x345   :  { %3058 = vrsqrt.f32 %v362_v6  ;;  %v371_v9 = vmul.f32 %v3049_v7, %v3364_v4 }
 0x346   :  { %3060 = vrsqrt.f32 %v361_v8 }
 0x347   :  { %v3051_v12 = vpop.eup %3050  ;;  %2764 = vmatprep.mubr.msk.f32.mxu1 %vm36_vm0, %v371_v9 }
 0x348   :  { %v3053_v14 = vpop.eup %3052  ;;  %2765 = vmatmul.mubr.msk.f32.vlgmr.msra.gmra.mrb[0].mxu1 %vm36_vm0, %v372_v10  ;;  %v374_v16 = vmul.f32 %v3051_v12, %v3370_v11 }
 0x349   :  { %v373_v15 = vmul.f32 %v3053_v14, %v3373_v13 }
 0x34b   :  { %v3055_v17 = vpop.eup %3054  ;;  %2767 = vmatprep.mubr.msk.f32.mxu1 %vm36_vm0, %v373_v15 }
 0x34c   :  { %v3057_v18 = vpop.eup %3056  ;;  %2768 = vmatmul.mubr.msk.f32.gmra.mrb[2].mxu1 %vm36_vm0, %v374_v16  ;;  %v376_v3 = vmul.f32 %v3055_v17, %v3380_v23 }
 0x34d   :  { %v375_v4 = vmul.f32 %v3057_v18, %v3383_v25 }
 0x34f   :  { %v3059_v19 = vpop.eup %3058  ;;  %2770 = vmatprep.mubr.msk.f32.mxu1 %vm36_vm0, %v375_v4 }
 0x350   :  { %v3061_v22 = vpop.eup %3060  ;;  %2771 = vmatmul.mubr.msk.f32.gmra.mrb[4].mxu1 %vm36_vm0, %v376_v3  ;;  %v378_v11 = vmul.f32 %v3059_v19, %v3390_v34 }
 0x351   :  { %v377_v13 = vmul.f32 %v3061_v22, %v3393_v36 }
 0x353   :  { %2773 = vmatprep.mubr.msk.f32.mxu1 %vm36_vm0, %v377_v13 }
 0x354   :  { %2774 = vmatmul.mubr.msk.f32.gmra.mrb[6].mxu1 %vm36_vm0, %v378_v11 }
 0x41b   :  { %v2766_v25 = vpop.f32.mrb[0].mxu1 }
 0x41c   :  { %v479_v23 = vadd.f32 %v2766_v25, %v2538_v24  ;;  %v473_v26 = vpop.f32.mrb[1].mxu1 }
 0x41d   :  { %v474_v27 = vadd.f32 %v2538_v24, %v473_v26 }
 0x41f   :  { %v3433_v30 = vpack.c.bf16 %v479_v23, %v474_v27  ;;  %v2769_v31 = vpop.f32.mrb[2].mxu1 }
 0x420   :  { %v489_v32 = vadd.f32 %v2769_v31, %v2538_v24  ;;  %v483_v33 = vpop.f32.mrb[3].mxu1 }
 0x421   :  { %v484_v20 = vadd.f32 %v2538_v24, %v483_v33  ;;  %518 = vrot.lane.b32.xlu0 %v3433_v30, %s3222_s17  ;;  %2780 = vmatprep.mubr.msk.bf16.mxu0 %vm522_vm1, %v3433_v30 }
 0x423   :  { %v3438_v34 = vpack.c.bf16 %v489_v32, %v484_v20  ;;  %v2772_v35 = vpop.f32.mrb[4].mxu1 }
 0x424   :  { %v499_v36 = vadd.f32 %v2772_v35, %v2538_v24  ;;  %v493_v28 = vpop.f32.mrb[5].mxu1 }
 0x425   :  { %v494_v21 = vadd.f32 %v2538_v24, %v493_v28  ;;  %735 = vrot.lane.b32.xlu0 %v3433_v30, %s3223_s18  ;;  %520 = vrot.lane.b32.xlu1 %v3438_v34, %s3222_s17 }
 0x427   :  { %v3442_v37 = vpack.c.bf16 %v499_v36, %v494_v21  ;;  %v2775_v40 = vpop.f32.mrb[6].mxu1 }
 0x428   :  { %v509_v29 = vadd.f32 %v2775_v40, %v2538_v24  ;;  %v503_v38 = vpop.f32.mrb[7].mxu1 }
 0x429   :  { %v504_v41 = vadd.f32 %v2538_v24, %v503_v38  ;;  %877 = vrot.lane.b32.xlu0 %v3433_v30, %s3224_s19  ;;  %586 = vrot.lane.b32.xlu1 %v3442_v37, %s3222_s17 }
 0x42a   :  { %2788 = vmatprep.mubr.msk.bf16.mxu1 %vm522_vm1, %v3442_v37 }
 0x42b   :  { %v3449_v42 = vpack.c.bf16 %v509_v29, %v504_v41 }
 0x42d   :  { %588 = vrot.lane.b32.xlu1 %v3449_v42, %s3222_s17 }
 0x431   :  { %737 = vrot.lane.b32.xlu1 %v3438_v34, %s3223_s18 }
 0x435   :  { %796 = vrot.lane.b32.xlu1 %v3442_v37, %s3223_s18 }
 0x439   :  { %879 = vrot.lane.b32.xlu1 %v3438_v34, %s3224_s19 }
 0x43d   :  { %798 = vrot.lane.b32.xlu1 %v3449_v42, %s3223_s18 }
 0x493   :  { %v519_v43 = vpop.permute.xlu0 %518 }
 0x494   :  { %3000 = vmatprep.subr.msk.bf16.mxu0 %vm522_vm1, %v519_v43  ;;  %v530_v39 = vsel %vm522_vm1, %v519_v43, 0 }
 0x495   :  { %2777 = vmatpush3.bf16.xpose.msra.mxu0 %v530_v39 }
 0x497   :  { %v521_v44 = vpop.permute.xlu1 %520  ;;  %v736_v48 = vpop.permute.xlu0 %735 }
 0x498   :  { %3001 = vmatprep.subr.msk.bf16.mxu0 %vm522_vm1, %v521_v44  ;;  %v533_v46 = vsel %vm522_vm1, %v521_v44, 0 }
 0x49b   :  { %v587_v45 = vpop.permute.xlu1 %586  ;;  %v3467_v53 = vpop.permute.xlu0 %877 }
 0x49c   :  { %3002 = vmatprep.subr.msk.bf16.mxu1 %vm522_vm1, %v587_v45  ;;  %v597_v47 = vsel %vm522_vm1, %v587_v45, 0 }
 0x49d   :  { %2779 = vmatpush3.bf16.xpose.msra.mxu0 %v533_v46  ;;  %2785 = vmatpush3.bf16.xpose.msra.mxu1 %v597_v47 }
 0x49e   :  { %2792 = vmatprep.subr.bf16.mxu0 %v736_v48 }
 0x49f   :  { %v589_v49 = vpop.permute.xlu1 %588 }
 0x4a0   :  { %3003 = vmatprep.subr.msk.bf16.mxu1 %vm522_vm1, %v589_v49  ;;  %v600_v51 = vsel %vm522_vm1, %v589_v49, 0 }
 0x4a3   :  { %v738_v50 = vpop.permute.xlu1 %737 }
 0x4a4   :  { %2781 = vmatmul.mubr.msk.bf16.vlgmr.msra.gmra.mrb[8].mxu0 %vm522_vm1, %v3438_v34 }
 0x4a5   :  { %2787 = vmatpush3.bf16.xpose.msra.mxu1 %v600_v51  ;;  %2793 = vmatpush3.bf16.msra.mxu0 %v736_v48 }
 0x4a6   :  { %2794 = vmatprep.subr.bf16.mxu0 %v738_v50 }
 0x4a7   :  { %v797_v52 = vpop.permute.xlu1 %796 }
 0x4a8   :  { %2800 = vmatprep.subr.bf16.mxu1 %v797_v52 }
 0x4a9   :  { %2795 = vmatpush3.bf16.msra.mxu0 %v738_v50 }
 0x4aa   :  { %3004 = vmatprep.subr.msk.bf16.mxu0 %vm522_vm1, %v3467_v53 }
 0x4ab   :  { %v3471_v54 = vpop.permute.xlu1 %879 }
 0x4ac   :  { %2789 = vmatmul.mubr.msk.bf16.vlgmr.msra.gmra.mrb[8].mxu1 %vm522_vm1, %v3449_v42 }
 0x4ad   :  { %2801 = vmatpush3.bf16.msra.mxu1 %v797_v52  ;;  %v888_v52 = vsel %vm522_vm1, %v3467_v53, 0 }
 0x4af   :  { %v799_v55 = vpop.permute.xlu1 %798 }
 0x4b0   :  { %2802 = vmatprep.subr.bf16.mxu1 %v799_v55 }
 0x4b1   :  { %2803 = vmatpush3.bf16.msra.mxu1 %v799_v55 }
 0x577   :  { %v2782_v56 = vpop.f32.mrb[8].mxu0 }
 0x578   :  { %v653_v57 = vmul.f32 0.35355338, %v2782_v56  ;;  %v569_v58 = vpop.f32.mrb[9].mxu0 }
 0x579   :  { %v2783_v59 = vpop.f32.mrb[10].mxu0  ;;  %v651_v60 = vmul.f32 0.35355338, %v569_v58 }
 0x57a   :  { %v572_v61 = vpop.f32.mrb[11].mxu0  ;;  %v665_v62 = vsel %vm36_vm0, %v653_v57, -inf  ;;  %v654_v1 = vmul.f32 0.35355338, %v2783_v59 }
 0x57b   :  { %v652_v63 = vmul.f32 0.35355338, %v572_v61  ;;  %666 = vmax.xlane.f32.xlu0 %v665_v62  ;;  %v659_v2 = vsel %vm36_vm0, %v651_v60, -inf  ;;  %v891_v61 = vsel %vm522_vm1, %v3471_v54, 0 }
 0x57c   :  { %v668_v12 = vsel %vm36_vm0, %v654_v1, -inf }
 0x57d   :  { %v662_v0 = vsel %vm36_vm0, %v652_v63, -inf }
 0x57e   :  { %663 = vmax.xlane.f32.xlu1 %v662_v0 }
 0x57f   :  { %v2790_v5 = vpop.f32.mrb[8].mxu1  ;;  %660 = vmax.xlane.f32.xlu0 %v659_v2 }
 0x580   :  { %v636_v6 = vpop.f32.mrb[9].mxu1  ;;  %v657_v8 = vmul.f32 0.35355338, %v2790_v5 }
 0x581   :  { %v2791_v7 = vpop.f32.mrb[10].mxu1  ;;  %v655_v16 = vmul.f32 0.35355338, %v636_v6 }
 0x582   :  { %v658_v9 = vmul.f32 0.35355338, %v2791_v7  ;;  %v639_v10 = vpop.f32.mrb[11].mxu1  ;;  %v677_v17 = vsel %vm36_vm0, %v657_v8, -inf }
 0x583   :  { %669 = vmax.xlane.f32.xlu0 %v668_v12  ;;  %v656_v14 = vmul.f32 0.35355338, %v639_v10  ;;  %v671_v4 = vsel %vm36_vm0, %v655_v16, -inf }
 0x584   :  { %v680_v15 = vsel %vm36_vm0, %v658_v9, -inf }
 0x585   :  { %681 = vmax.xlane.f32.xlu1 %v680_v15  ;;  %v674_v18 = vsel %vm36_vm0, %v656_v14, -inf }
 0x587   :  { %678 = vmax.xlane.f32.xlu0 %v677_v17 }
 0x589   :  { %675 = vmax.xlane.f32.xlu1 %v674_v18 }
 0x58b   :  { %672 = vmax.xlane.f32.xlu0 %v671_v4 }
 0x59a   :  { %873 = vrot.lane.b32.xlu1 %v3433_v30, %s3225_s20 }
 0x59e   :  { %948 = vrot.lane.b32.xlu1 %v3449_v42, %s3224_s19 }
 0x5a1   :  { %946 = vrot.lane.b32.xlu0 %v3442_v37, %s3224_s19 }
 0x5a2   :  { %944 = vrot.lane.b32.xlu1 %v3449_v42, %s3225_s20 }
 0x5a5   :  { %875 = vrot.lane.b32.xlu0 %v3438_v34, %s3225_s20 }
 0x5a9   :  { %942 = vrot.lane.b32.xlu0 %v3442_v37, %s3225_s20 }
 0x608   :  { %v667_v3 = vpop.xlane.xlu0 %666 }
 0x609   :  { %v685_v22 = vsub.f32 %v653_v57, %v667_v3 }
 0x60b   :  { %v664_v19 = vpop.xlane.xlu1 %663  ;;  %v695_v26 = vmul.f32 1.442695, %v685_v22 }
 0x60c   :  { %v684_v13 = vsub.f32 %v652_v63, %v664_v19  ;;  %v661_v11 = vpop.xlane.xlu0 %660 }
 0x60d   :  { %v683_v24 = vsub.f32 %v651_v60, %v661_v11 }
 0x60e   :  { %v693_v25 = vmul.f32 1.442695, %v684_v13 }
 0x60f   :  { %v691_v23 = vmul.f32 1.442695, %v683_v24 }
 0x610   :  { %3062 = vpow2.f32 %v693_v25  ;;  %v670_v27 = vpop.xlane.xlu0 %669 }
 0x611   :  { %3064 = vpow2.f32 %v691_v23  ;;  %v686_v31 = vsub.f32 %v654_v1, %v670_v27 }
 0x612   :  { %v682_v32 = vpop.xlane.xlu1 %681  ;;  %3066 = vpow2.f32 %v695_v26 }
 0x613   :  { %v697_v33 = vmul.f32 1.442695, %v686_v31  ;;  %v690_v36 = vsub.f32 %v658_v9, %v682_v32 }
 0x614   :  { %v679_v20 = vpop.xlane.xlu0 %678 }
 0x615   :  { %3068 = vpow2.f32 %v697_v33  ;;  %v689_v35 = vsub.f32 %v657_v8, %v679_v20  ;;  %v705_v39 = vmul.f32 1.442695, %v690_v36 }
 0x616   :  { %v676_v28 = vpop.xlane.xlu1 %675 }
 0x617   :  { %v703_v21 = vmul.f32 1.442695, %v689_v35  ;;  %v688_v40 = vsub.f32 %v656_v14, %v676_v28 }
 0x618   :  { %v673_v29 = vpop.xlane.xlu0 %672 }
 0x619   :  { %v701_v38 = vmul.f32 1.442695, %v688_v40  ;;  %v687_v41 = vsub.f32 %v655_v16, %v673_v29  ;;  %3070 = vpow2.f32 %v703_v21 }
 0x61a   :  { %v3491_v43 = vpop.eup %3062  ;;  %v874_v51 = vpop.permute.xlu1 %873 }
 0x61b   :  { %v3493_v44 = vpop.eup %3064  ;;  %v699_v45 = vmul.f32 1.442695, %v687_v41  ;;  %3072 = vpow2.f32 %v701_v38 }
 0x61c   :  { %v947_v46 = vpop.permute.xlu0 %946  ;;  %v731_v47 = vpack.c.bf16 %v3491_v43, %v3493_v44  ;;  %v3498_v48 = vpop.eup %3066 }
 0x61d   :  { %3074 = vpow2.f32 %v699_v45  ;;  %3006 = vmatprep.subr.msk.bf16.mxu1 %vm522_vm1, %v947_v46  ;;  %v957_v62 = vsel %vm522_vm1, %v947_v46, 0 }
 0x61e   :  { %3076 = vpow2.f32 %v705_v39  ;;  %2796 = vmatprep.mubr.msk.bf16.mxu0 %vm36_vm0, %v731_v47  ;;  %v949_v0 = vpop.permute.xlu1 %948 }
 0x61f   :  { %v3501_v49 = vpop.eup %3068  ;;  %v960_v1 = vsel %vm522_vm1, %v949_v0, 0 }
 0x620   :  { %v732_v50 = vpack.c.bf16 %v3501_v49, %v3498_v48  ;;  %v876_v56 = vpop.permute.xlu0 %875 }
 0x622   :  { %2797 = vmatmul.mubr.msk.bf16.vlgmr.msra.gmra.mrb[12].mxu0 %vm36_vm0, %v732_v50 }
 0x623   :  { %2809 = vmatpush3.bf16.xpose.msra.mxu0 %v888_v52  ;;  %2812 = vmatprep.mubr.msk.bf16.mxu0 %vm522_vm1, %v874_v51  ;;  %v3511_v55 = vpop.eup %3070 }
 0x624   :  { %3005 = vmatprep.subr.msk.bf16.mxu0 %vm522_vm1, %v3471_v54  ;;  %v943_v63 = vpop.permute.xlu0 %942  ;;  %v945_v54 = vpop.permute.xlu1 %944 }
 0x625   :  { %v3513_v57 = vpop.eup %3072 }
 0x627   :  { %v3515_v58 = vpop.eup %3074 }
 0x628   :  { %v3517_v59 = vpop.eup %3076  ;;  %v733_v60 = vpack.c.bf16 %v3513_v57, %v3515_v58 }
 0x629   :  { %v734_v53 = vpack.c.bf16 %v3517_v59, %v3511_v55 }
 0x62a   :  { %2804 = vmatprep.mubr.msk.bf16.mxu1 %vm36_vm0, %v733_v60 }
 0x62b   :  { %2811 = vmatpush3.bf16.xpose.msra.mxu0 %v891_v61  ;;  %2805 = vmatmul.mubr.msk.bf16.vlgmr.msra.gmra.mrb[12].mxu1 %vm36_vm0, %v734_v53 }
 0x62c   :  { %2817 = vmatpush3.bf16.xpose.msra.mxu1 %v957_v62  ;;  %2820 = vmatprep.mubr.msk.bf16.mxu1 %vm522_vm1, %v943_v63 }
 0x62d   :  { %3007 = vmatprep.subr.msk.bf16.mxu1 %vm522_vm1, %v949_v0 }
 0x632   :  { %2813 = vmatmul.mubr.msk.bf16.vlgmr.msra.gmra.mrb[16].mxu0 %vm522_vm1, %v876_v56 }
 0x634   :  { %2819 = vmatpush3.bf16.xpose.msra.mxu1 %v960_v1 }
 0x63b   :  { %2821 = vmatmul.mubr.msk.bf16.vlgmr.msra.gmra.mrb[16].mxu1 %vm522_vm1, %v945_v54 }
 0x6f5   :  { %v3533_v2 = vpop.f32.mrb[12].mxu0 }
 0x6f6   :  { %v3535_v5 = vpop.f32.mrb[13].mxu0 }
 0x6f7   :  { %v3537_v6 = vpop.f32.mrb[14].mxu0 }
 0x6f8   :  { %v3539_v7 = vpop.f32.mrb[15].mxu0 }
 0x6fe   :  { %v3541_v8 = vpop.f32.mrb[12].mxu1 }
 0x6ff   :  { %v3543_v9 = vpop.f32.mrb[13].mxu1 }
 0x700   :  { %v3545_v10 = vpop.f32.mrb[14].mxu1 }
 0x701   :  { %v3547_v12 = vpop.f32.mrb[15].mxu1 }
 0x705   :  { %v2814_v14 = vpop.f32.mrb[16].mxu0 }
 0x706   :  { %v1013_v15 = vmul.f32 0.35355338, %v2814_v14  ;;  %v927_v16 = vpop.f32.mrb[17].mxu0 }
 0x707   :  { %v2815_v17 = vpop.f32.mrb[18].mxu0  ;;  %v1011_v18 = vmul.f32 0.35355338, %v927_v16 }
 0x708   :  { %v930_v4 = vpop.f32.mrb[19].mxu0  ;;  %v1025_v3 = vsel %vm36_vm0, %v1013_v15, -inf  ;;  %v1014_v13 = vmul.f32 0.35355338, %v2815_v17 }
 0x709   :  { %v1012_v19 = vmul.f32 0.35355338, %v930_v4  ;;  %1026 = vmax.xlane.f32.xlu0 %v1025_v3  ;;  %v1019_v11 = vsel %vm36_vm0, %v1011_v18, -inf }
 0x70a   :  { %v1028_v27 = vsel %vm36_vm0, %v1014_v13, -inf }
 0x70b   :  { %v1022_v22 = vsel %vm36_vm0, %v1012_v19, -inf }
 0x70c   :  { %1023 = vmax.xlane.f32.xlu1 %v1022_v22 }
 0x70d   :  { %1020 = vmax.xlane.f32.xlu0 %v1019_v11 }
 0x70e   :  { %v2822_v24 = vpop.f32.mrb[16].mxu1 }
 0x70f   :  { %v996_v25 = vpop.f32.mrb[17].mxu1  ;;  %v1017_v23 = vmul.f32 0.35355338, %v2822_v24 }
 0x710   :  { %v2823_v26 = vpop.f32.mrb[18].mxu1  ;;  %v1015_v32 = vmul.f32 0.35355338, %v996_v25 }
 0x711   :  { %1029 = vmax.xlane.f32.xlu0 %v1028_v27  ;;  %v999_v31 = vpop.f32.mrb[19].mxu1  ;;  %v1037_v33 = vsel %vm36_vm0, %v1017_v23, -inf  ;;  %v3558_v35 = vmul.f32 0.35355338, %v2823_v26 }
 0x712   :  { %v1031_v20 = vsel %vm36_vm0, %v1015_v32, -inf  ;;  %v3560_v36 = vmul.f32 0.35355338, %v999_v31 }
 0x713   :  { %v1040_v28 = vsel %vm36_vm0, %v3558_v35, -inf }
 0x714   :  { %v1034_v21 = vsel %vm36_vm0, %v3560_v36, -inf }
 0x715   :  { %1038 = vmax.xlane.f32.xlu0 %v1037_v33 }
 0x719   :  { %1032 = vmax.xlane.f32.xlu0 %v1031_v20 }
 0x71d   :  { %1097 = vrot.lane.b32.xlu1 %v3438_v34, %s3226_s21 }
 0x721   :  { %1156 = vrot.lane.b32.xlu1 %v3442_v37, %s3226_s21 }
 0x72f   :  { %1095 = vrot.lane.b32.xlu0 %v3433_v30, %s3226_s21 }
 0x745   :  { %1041 = vmax.xlane.f32.xlu1 %v1040_v28 }
 0x749   :  { %1035 = vmax.xlane.f32.xlu1 %v1034_v21 }
 0x75a   :  { %1158 = vrot.lane.b32.xlu1 %v3449_v42, %s3226_s21  ;;  %s3233_s21 = smov [#allocation2]  }
 0x796   :  { %v1027_v40 = vpop.xlane.xlu0 %1026 }
 0x797   :  { %v1045_v29 = vsub.f32 %v1013_v15, %v1027_v40  ;;  %v22_v40 = vld [vmem:[%s3846_s1 + $0x48] sm:$0xff] }
 0x799   :  { %v1055_v38 = vmul.f32 1.442695, %v1045_v29  ;;  %v1024_v41 = vpop.xlane.xlu1 %1023 }
 0x79a   :  { %v1044_v39 = vsub.f32 %v1012_v19, %v1024_v41  ;;  %v1021_v45 = vpop.xlane.xlu0 %1020 }
 0x79b   :  { %3078 = vpow2.f32 %v1055_v38  ;;  %v1043_v46 = vsub.f32 %v1011_v18, %v1021_v45  ;;  %v707_v45 = vsel %vm36_vm0, %v3493_v44, 0.0  ;;  %v725_v44 = vsel %vm36_vm0, %v3511_v55, 0.0  ;;  %v21_v55 = vld [vmem:[%s3846_s1 + $0x40] sm:$0xff] }
 0x79c   :  { %v1053_v47 = vmul.f32 1.442695, %v1044_v39 }
 0x79d   :  { %v1051_v50 = vmul.f32 1.442695, %v1043_v46  ;;  %v1098_v51 = vpop.permute.xlu1 %1097  ;;  %v713_v46 = vsel %vm36_vm0, %v3498_v48, 0.0  ;;  %v710_v48 = vsel %vm36_vm0, %v3491_v43, 0.0 }
 0x79e   :  { %3080 = vpow2.f32 %v1053_v47  ;;  %v1030_v52 = vpop.xlane.xlu0 %1029  ;;  %v716_v47 = vsel %vm36_vm0, %v3501_v49, 0.0  ;;  %v722_v49 = vsel %vm36_vm0, %v3513_v57, 0.0 }
 0x79f   :  { %3082 = vpow2.f32 %v1051_v50  ;;  %v1046_v56 = vsub.f32 %v1014_v13, %v1030_v52  ;;  %v719_v50 = vsel %vm36_vm0, %v3515_v58, 0.0 }
 0x7a1   :  { %v1057_v60 = vmul.f32 1.442695, %v1046_v56  ;;  %v1157_v53 = vpop.permute.xlu1 %1156 }
 0x7a2   :  { %2832 = vmatprep.subr.bf16.mxu1 %v1157_v53  ;;  %v1039_v61 = vpop.xlane.xlu0 %1038 }
 0x7a3   :  { %3084 = vpow2.f32 %v1057_v60  ;;  %v1049_v62 = vsub.f32 %v1017_v23, %v1039_v61  ;;  %2833 = vmatpush3.bf16.msra.mxu1 %v1157_v53 }
 0x7a5   :  { %v3079_v63 = vpop.eup %3078  ;;  %v1063_v0 = vmul.f32 1.442695, %v1049_v62 }
 0x7a6   :  { %v1033_v1 = vpop.xlane.xlu0 %1032  ;;  %v1073_v54 = vsel %vm36_vm0, %v3079_v63, 0.0 }
 0x7a7   :  { %3086 = vpow2.f32 %v1063_v0  ;;  %v1047_v14 = vsub.f32 %v1015_v32, %v1033_v1  ;;  %1074 = vadd.xlane.f32.xlu0 %v1073_v54 }
 0x7a8   :  { %v3081_v15 = vpop.eup %3080 }
 0x7a9   :  { %v3083_v16 = vpop.eup %3082  ;;  %v1059_v17 = vmul.f32 1.442695, %v1047_v14  ;;  %v1070_v18 = vsel %vm36_vm0, %v3081_v15, 0.0 }
 0x7aa   :  { %1071 = vadd.xlane.f32.xlu1 %v1070_v18  ;;  %v1096_v4 = vpop.permute.xlu0 %1095  ;;  %v1067_v3 = vsel %vm36_vm0, %v3083_v16, 0.0  ;;  %v1091_v19 = vpack.c.bf16 %v3081_v15, %v3083_v16 }
 0x7ab   :  { %3088 = vpow2.f32 %v1059_v17  ;;  %1068 = vadd.xlane.f32.xlu0 %v1067_v3  ;;  %2824 = vmatprep.subr.bf16.mxu0 %v1096_v4 }
 0x7ac   :  { %2825 = vmatpush3.bf16.msra.mxu0 %v1096_v4  ;;  %2828 = vmatprep.mubr.msk.bf16.mxu0 %vm36_vm0, %v1091_v19 }
 0x7ad   :  { %v3085_v22 = vpop.eup %3084  ;;  %2826 = vmatprep.subr.bf16.mxu0 %v1098_v51 }
 0x7ae   :  { %v1076_v13 = vsel %vm36_vm0, %v3085_v22, 0.0  ;;  %v1092_v24 = vpack.c.bf16 %v3085_v22, %v3079_v63 }
 0x7af   :  { %1077 = vadd.xlane.f32.xlu0 %v1076_v13 }
 0x7b0   :  { %2827 = vmatpush3.bf16.msra.mxu0 %v1098_v51  ;;  %v728_v51 = vsel %vm36_vm0, %v3517_v59, 0.0 }
 0x7b1   :  { %v3087_v11 = vpop.eup %3086  ;;  %2854 = vmatprep.subr.mxu0 %v21_v55 }
 0x7b2   :  { %v1085_v25 = vsel %vm36_vm0, %v3087_v11, 0.0 }
 0x7b3   :  { %1086 = vadd.xlane.f32.xlu0 %v1085_v25  ;;  %2829 = vmatmul.mubr.msk.bf16.vlgmr.msra.gmra.mrb[20].mxu0 %vm36_vm0, %v1092_v24 }
 0x7b4   :  { %2855 = vmatpush3.msra.mxu0 %v21_v55 }
 0x7b5   :  { %v3089_v23 = vpop.eup %3088 }
 0x7b6   :  { %v1079_v26 = vsel %vm36_vm0, %v3089_v23, 0.0 }
 0x7b7   :  { %1080 = vadd.xlane.f32.xlu0 %v1079_v26 }
 0x7bb   :  { %1497 = vrot.lane.b32.xlu1 %v3438_v34, %s3227_s22 }
 0x7bf   :  { %1491 = vrot.lane.b32.xlu1 %v3433_v30, %s3228_s23 }
 0x7cd   :  { %1495 = vrot.lane.b32.xlu0 %v3433_v30, %s3227_s22 }
 0x7d1   :  { %1493 = vrot.lane.b32.xlu0 %v3438_v34, %s3228_s23 }
 0x7d2   :  { %v1042_v27 = vpop.xlane.xlu1 %1041 }
 0x7d3   :  { %v1050_v31 = vsub.f32 %v3558_v35, %v1042_v27 }
 0x7d5   :  { %v1065_v32 = vmul.f32 1.442695, %v1050_v31  ;;  %1560 = vrot.lane.b32.xlu0 %v3442_v37, %s3228_s23 }
 0x7d6   :  { %v1036_v33 = vpop.xlane.xlu1 %1035 }
 0x7d7   :  { %3090 = vpow2.f32 %v1065_v32  ;;  %v1048_v20 = vsub.f32 %v3560_v36, %v1036_v33 }
 0x7d9   :  { %v1061_v28 = vmul.f32 1.442695, %v1048_v20 }
 0x7da   :  { %v1159_v21 = vpop.permute.xlu1 %1158 }
 0x7db   :  { %3092 = vpow2.f32 %v1061_v28  ;;  %2834 = vmatprep.subr.bf16.mxu1 %v1159_v21 }
 0x7dc   :  { %2835 = vmatpush3.bf16.msra.mxu1 %v1159_v21 }
 0x7dd   :  { %2840 = vmatprep.subr.mxu1 %v22_v40 }
 0x7e1   :  { %v3091_v29 = vpop.eup %3090 }
 0x7e2   :  { %v1088_v35 = vsel %vm36_vm0, %v3091_v29, 0.0  ;;  %v1094_v36 = vpack.c.bf16 %v3091_v29, %v3087_v11 }
 0x7e3   :  { %1089 = vadd.xlane.f32.xlu1 %v1088_v35 }
 0x7e5   :  { %v3093_v38 = vpop.eup %3092 }
 0x7e6   :  { %v1082_v41 = vsel %vm36_vm0, %v3093_v38, 0.0  ;;  %v1093_v39 = vpack.c.bf16 %v3093_v38, %v3089_v23 }
 0x7e7   :  { %1083 = vadd.xlane.f32.xlu1 %v1082_v41 }
 0x7e8   :  { %2836 = vmatprep.mubr.msk.bf16.mxu1 %vm36_vm0, %v1093_v39 }
 0x7e9   :  { %2837 = vmatmul.mubr.msk.bf16.vlgmr.msra.gmra.mrb[20].mxu1 %vm36_vm0, %v1094_v36 }
 0x7ea   :  { %2841 = vmatpush3.msra.mxu1 %v22_v40 }
 0x7f4   :  { %708 = vadd.xlane.f32.xlu0 %v707_v45 }
 0x7f8   :  { %1564 = vrot.lane.b32.xlu1 %v3442_v37, %s3227_s22  ;;  %714 = vadd.xlane.f32.xlu0 %v713_v46 }
 0x7fc   :  { %1566 = vrot.lane.b32.xlu1 %v3449_v42, %s3227_s22  ;;  %717 = vadd.xlane.f32.xlu0 %v716_v47  ;;  %s2518_s22 = sshll.u32 %s3233_s21, 4  ;;  %s2519_s22 = int_to_ptr.vmem [resolvable:$true] %s2518_s22 }
 0x7fd   :  { %s3198_s27 = scalar_lea.vmem %s2519_s22, 1024  ;;  %p3203_p1 = scmp.lt.s32.totalorder %s2519_s22, %s2519_s22 }
 0x7fe   :  { %p3199_p0 = scmp.ne.s32.totalorder %s2519_s22, %s3198_s27  ;;  %p3204_p2 = scmp.lt.s32.totalorder %s3198_s27, %s3198_s27 }
 0x800   :  { %1562 = vrot.lane.b32.xlu1 %v3449_v42, %s3228_s23  ;;  %720 = vadd.xlane.f32.xlu0 %v719_v50  ;;  %p3205_p3 = por %p3204_p2, %p3203_p1 }
 0x802   :  { %p3206_p4 = pnand %p3205_p3, %p3199_p0 }
 0x804   :  { %726 = vadd.xlane.f32.xlu0 %v725_v44 }
 0x824   :  { %711 = vadd.xlane.f32.xlu1 %v710_v48 }
 0x828   :  { %723 = vadd.xlane.f32.xlu1 %v722_v49 }
 0x82c   :  { %729 = vadd.xlane.f32.xlu1 %v728_v51 }
 0x834   :  { %v1075_v58 = vpop.xlane.xlu0 %1074 }
 0x835   :  { %3094 = vrcp.f32 %v1075_v58 }
 0x837   :  { %v1072_v61 = vpop.xlane.xlu1 %1071 }
 0x838   :  { %v1069_v52 = vpop.xlane.xlu0 %1068 }
 0x839   :  { %3096 = vrcp.f32 %v1069_v52 }
 0x83b   :  { %v1498_v62 = vpop.permute.xlu1 %1497 }
 0x83c   :  { %v1078_v56 = vpop.xlane.xlu0 %1077  ;;  %v1509_v27 = vsel %vm522_vm1, %v1498_v62, 0 }
 0x83d   :  { %3098 = vrcp.f32 %v1078_v56 }
 0x83e   :  { %3100 = vrcp.f32 %v1072_v61 }
 0x83f   :  { %v3624_v0 = vpop.permute.xlu1 %1491  ;;  %v3095_v1 = vpop.eup %3094 }
 0x840   :  { %v1087_v60 = vpop.xlane.xlu0 %1086 }
 0x843   :  { %v3097_v14 = vpop.eup %3096 }
 0x844   :  { %v1081_v43 = vpop.xlane.xlu0 %1080 }
 0x847   :  { %v3099_v17 = vpop.eup %3098 }
 0x848   :  { %v1496_v53 = vpop.permute.xlu0 %1495  ;;  %v3101_v3 = vpop.eup %3100 }
 0x849   :  { %3008 = vmatprep.subr.msk.bf16.mxu1 %vm522_vm1, %v1496_v53  ;;  %v1506_v25 = vsel %vm522_vm1, %v1496_v53, 0 }
 0x84c   :  { %v3620_v57 = vpop.permute.xlu0 %1493 }
 0x850   :  { %v3622_v59 = vpop.permute.xlu0 %1560 }
 0x870   :  { %v1090_v19 = vpop.xlane.xlu1 %1089 }
 0x874   :  { %v1084_v26 = vpop.xlane.xlu1 %1083 }
 0x878   :  { %v1565_v31 = vpop.permute.xlu1 %1564 }
 0x87c   :  { %v1567_v33 = vpop.permute.xlu1 %1566 }
 0x880   :  { %v1563_v28 = vpop.permute.xlu1 %1562 }
 0x881   :  { %v709_v63 = vpop.xlane.xlu0 %708 }
 0x882   :  { %3102 = vrcp.f32 %v709_v63 }
 0x883   :  { %3104 = vrcp.f32 %v1087_v60 }
 0x884   :  { %3106 = vrcp.f32 %v1081_v43 }
 0x885   :  { %v715_v32 = vpop.xlane.xlu0 %714 }
 0x886   :  { %v2830_v54 = vpop.f32.mrb[20].mxu0  ;;  %3108 = vrcp.f32 %v715_v32 }
 0x887   :  { %v1227_v15 = vmul.f32 %v3095_v1, %v2830_v54  ;;  %v1141_v16 = vpop.f32.mrb[21].mxu0  ;;  %v1575_v1 = vsel %vm522_vm1, %v1565_v31, 0 }
 0x888   :  { %v1225_v18 = vmul.f32 %v3097_v14, %v1141_v16  ;;  %v2831_v4 = vpop.f32.mrb[22].mxu0 }
 0x889   :  { %v1228_v22 = vmul.f32 %v3099_v17, %v2831_v4  ;;  %v1144_v13 = vpop.f32.mrb[23].mxu0  ;;  %v718_v20 = vpop.xlane.xlu0 %717 }
 0x88a   :  { %v1226_v11 = vmul.f32 %v3101_v3, %v1144_v13  ;;  %2842 = vmatprep.mubr.msk.f32.mxu1 %vm522_vm1, %v1225_v18 }
 0x88c   :  { %v3103_v24 = vpop.eup %3102  ;;  %2843 = vmatmul.mubr.msk.f32.vlgmr.msra.gmra.mrb[24].mxu1 %vm522_vm1, %v1226_v11 }
 0x88d   :  { %2869 = vmatpush3.bf16.xpose.msra.mxu1 %v1506_v25  ;;  %2845 = vmatprep.mubr.msk.f32.mxu1 %vm522_vm1, %v1227_v15  ;;  %v865_v23 = vmul.f32 %v3103_v24, %v3535_v5  ;;  %v721_v5 = vpop.xlane.xlu0 %720  ;;  %v3105_v35 = vpop.eup %3104 }
 0x88e   :  { %3009 = vmatprep.subr.msk.bf16.mxu1 %vm522_vm1, %v1498_v62  ;;  %v3107_v41 = vpop.eup %3106 }
 0x88f   :  { %2856 = vmatprep.mubr.msk.f32.mxu0 %vm522_vm1, %v865_v23 }
 0x890   :  { %2846 = vmatmul.mubr.msk.f32.gmra.mrb[26].mxu1 %vm522_vm1, %v1228_v22  ;;  %v3109_v39 = vpop.eup %3108 }
 0x891   :  { %v727_v29 = vpop.xlane.xlu0 %726  ;;  %v867_v58 = vmul.f32 %v3109_v39, %v3533_v2 }
 0x895   :  { %2871 = vmatpush3.bf16.xpose.msra.mxu1 %v1509_v27 }
 0x896   :  { %3010 = vmatprep.subr.msk.bf16.mxu1 %vm522_vm1, %v1565_v31 }
 0x8b1   :  { %v712_v21 = vpop.xlane.xlu1 %711 }
 0x8b2   :  { %3110 = vrcp.f32 %v712_v21 }
 0x8b3   :  { %3112 = vrcp.f32 %v1084_v26 }
 0x8b4   :  { %3114 = vrcp.f32 %v718_v20 }
 0x8b5   :  { %3116 = vrcp.f32 %v721_v5  ;;  %v724_v40 = vpop.xlane.xlu1 %723 }
 0x8b6   :  { %3118 = vrcp.f32 %v1090_v19 }
 0x8b7   :  { %3120 = vrcp.f32 %v724_v40 }
 0x8b8   :  { %3122 = vrcp.f32 %v727_v29 }
 0x8b9   :  { %v730_v38 = vpop.xlane.xlu1 %729 }
 0x8ba   :  { %3124 = vrcp.f32 %v730_v38 }
 0x8bc   :  { %v3111_v36 = vpop.eup %3110  ;;  %v2838_v45 = vpop.f32.mrb[20].mxu1 }
 0x8bd   :  { %v3113_v46 = vpop.eup %3112  ;;  %v866_v47 = vmul.f32 %v3111_v36, %v3539_v7  ;;  %v1231_v50 = vmul.f32 %v3105_v35, %v2838_v45  ;;  %v1202_v44 = vpop.f32.mrb[21].mxu1 }
 0x8be   :  { %v3115_v48 = vpop.eup %3114  ;;  %v1229_v49 = vmul.f32 %v3107_v41, %v1202_v44  ;;  %v2839_v51 = vpop.f32.mrb[22].mxu1 }
 0x8bf   :  { %v3117_v52 = vpop.eup %3116  ;;  %v1205_v56 = vpop.f32.mrb[23].mxu1  ;;  %2857 = vmatmul.mubr.msk.f32.vlgmr.msra.gmra.mrb[24].mxu0 %vm522_vm1, %v866_v47  ;;  %v868_v43 = vmul.f32 %v3115_v48, %v3537_v6 }
 0x8c0   :  { %v1230_v55 = vmul.f32 %v3113_v46, %v1205_v56  ;;  %2848 = vmatprep.mubr.msk.f32.mxu1 %vm522_vm1, %v1229_v49  ;;  %2859 = vmatprep.mubr.msk.f32.mxu0 %vm522_vm1, %v867_v58  ;;  %v3119_v60 = vpop.eup %3118  ;;  %v869_v53 = vmul.f32 %v3117_v52, %v3543_v9 }
 0x8c1   :  { %v3121_v7 = vpop.eup %3120  ;;  %v1232_v2 = vmul.f32 %v3119_v60, %v2839_v51 }
 0x8c2   :  { %2849 = vmatmul.mubr.msk.f32.gmra.mrb[28].mxu1 %vm522_vm1, %v1230_v55  ;;  %v3123_v61 = vpop.eup %3122  ;;  %v870_v62 = vmul.f32 %v3121_v7, %v3547_v12 }
 0x8c3   :  { %2851 = vmatprep.mubr.msk.f32.mxu1 %vm522_vm1, %v1231_v50  ;;  %2860 = vmatmul.mubr.msk.f32.gmra.mrb[26].mxu0 %vm522_vm1, %v868_v43  ;;  %v871_v6 = vmul.f32 %v3123_v61, %v3541_v8  ;;  %v1578_v8 = vsel %vm522_vm1, %v1567_v33, 0 }
 0x8c4   :  { %2862 = vmatprep.mubr.msk.f32.mxu0 %vm522_vm1, %v869_v53  ;;  %v3125_v63 = vpop.eup %3124 }
 0x8c5   :  { %v872_v9 = vmul.f32 %v3125_v63, %v3545_v10 }
 0x8c6   :  { %2852 = vmatmul.mubr.msk.f32.gmra.mrb[30].mxu1 %vm522_vm1, %v1232_v2 }
 0x8c7   :  { %2863 = vmatmul.mubr.msk.f32.gmra.mrb[28].mxu0 %vm522_vm1, %v870_v62  ;;  %2872 = vmatprep.mubr.msk.bf16.mxu1 %vm522_vm1, %v3624_v0 }
 0x8c8   :  { %2865 = vmatprep.mubr.msk.f32.mxu0 %vm522_vm1, %v871_v6 }
 0x8ca   :  { %2873 = vmatmul.mubr.msk.bf16.vlgmr.msra.gmra.mrb[32].mxu1 %vm522_vm1, %v3620_v57 }
 0x8cb   :  { %2877 = vmatpush3.bf16.xpose.msra.mxu1 %v1575_v1  ;;  %2866 = vmatmul.mubr.msk.f32.gmra.mrb[30].mxu0 %vm522_vm1, %v872_v9 }
 0x8cc   :  { %3011 = vmatprep.subr.msk.bf16.mxu1 %vm522_vm1, %v1567_v33  ;;  %2880 = vmatprep.mubr.msk.bf16.mxu1 %vm522_vm1, %v3622_v59 }
 0x8d3   :  { %2879 = vmatpush3.bf16.xpose.msra.mxu1 %v1578_v8 }
 0x8da   :  { %2881 = vmatmul.mubr.msk.bf16.vlgmr.msra.gmra.mrb[36].mxu1 %vm522_vm1, %v1563_v28 }
 0x95f   :  { %v3664_v12 = vpop.f32.mrb[24].mxu1 }
 0x960   :  { %v3666_v10 = vpop.f32.mrb[25].mxu1 }
 0x963   :  { %v3668_v0 = vpop.f32.mrb[26].mxu1 }
 0x964   :  { %v3670_v57 = vpop.f32.mrb[27].mxu1 }
 0x995   :  { %v3672_v54 = vpop.f32.mrb[28].mxu1 }
 0x996   :  { %v3674_v14 = vpop.f32.mrb[29].mxu1 }
 0x999   :  { %v3676_v15 = vpop.f32.mrb[30].mxu1 }
 0x99a   :  { %v3678_v59 = vpop.f32.mrb[31].mxu1 }
 0x99d   :  { %v2874_v16 = vpop.f32.mrb[32].mxu1 }
 0x99e   :  { %v1631_v17 = vmul.f32 0.35355338, %v2874_v16  ;;  %v1545_v18 = vpop.f32.mrb[33].mxu1 }
 0x99f   :  { %v1629_v4 = vmul.f32 0.35355338, %v1545_v18  ;;  %v2875_v3 = vpop.f32.mrb[34].mxu1  ;;  %v23_v18 = vld [vmem:[%s3846_s1 + $0x50] sm:$0xff] }
 0x9a0   :  { %v1548_v19 = vpop.f32.mrb[35].mxu1  ;;  %v1643_v22 = vsel %vm36_vm0, %v1631_v17, -inf  ;;  %v1632_v13 = vmul.f32 0.35355338, %v2875_v3 }
 0x9a1   :  { %v1630_v11 = vmul.f32 0.35355338, %v1548_v19  ;;  %1644 = vmax.xlane.f32.xlu0 %v1643_v22  ;;  %v1637_v24 = vsel %vm36_vm0, %v1629_v4, -inf }
 0x9a2   :  { %1638 = vmax.xlane.f32.xlu1 %v1637_v24  ;;  %v1646_v23 = vsel %vm36_vm0, %v1632_v13, -inf }
 0x9a3   :  { %v1640_v25 = vsel %vm36_vm0, %v1630_v11, -inf }
 0x9a5   :  { %1641 = vmax.xlane.f32.xlu0 %v1640_v25 }
 0x9a6   :  { %1647 = vmax.xlane.f32.xlu1 %v1646_v23 }
 0x9ad   :  { %v2882_v26 = vpop.f32.mrb[36].mxu1 }
 0x9ae   :  { %v1635_v27 = vmul.f32 0.35355338, %v2882_v26  ;;  %v1614_v31 = vpop.f32.mrb[37].mxu1 }
 0x9af   :  { %v2883_v32 = vpop.f32.mrb[38].mxu1  ;;  %v1633_v33 = vmul.f32 0.35355338, %v1614_v31 }
 0x9b0   :  { %v1617_v20 = vpop.f32.mrb[39].mxu1  ;;  %v1655_v28 = vsel %vm36_vm0, %v1635_v27, -inf  ;;  %v3691_v21 = vmul.f32 0.35355338, %v2883_v32 }
 0x9b1   :  { %1656 = vmax.xlane.f32.xlu0 %v1655_v28  ;;  %v1649_v5 = vsel %vm36_vm0, %v1633_v33, -inf  ;;  %v3693_v40 = vmul.f32 0.35355338, %v1617_v20 }
 0x9b2   :  { %v1658_v29 = vsel %vm36_vm0, %v3691_v21, -inf }
 0x9b3   :  { %v1652_v35 = vsel %vm36_vm0, %v3693_v40, -inf }
 0x9b5   :  { %1650 = vmax.xlane.f32.xlu0 %v1649_v5 }
 0x9b7   :  { %1715 = vrot.lane.b32.xlu1 %v3438_v34, %s3229_s28 }
 0x9bb   :  { %1774 = vrot.lane.b32.xlu1 %v3442_v37, %s3229_s28 }
 0x9cb   :  { %1713 = vrot.lane.b32.xlu0 %v3433_v30, %s3229_s28 }
 0x9cf   :  { %1992 = vrot.lane.b32.xlu0 %v3433_v30, %s3230_s29 }
 0x9df   :  { %1659 = vmax.xlane.f32.xlu1 %v1658_v29 }
 0x9e3   :  { %1653 = vmax.xlane.f32.xlu1 %v1652_v35 }
 0x9f4   :  { %1776 = vrot.lane.b32.xlu1 %v3449_v42, %s3229_s28 }
 0x9f8   :  { %1994 = vrot.lane.b32.xlu1 %v3438_v34, %s3230_s29 }
 0x9fc   :  { %2061 = vrot.lane.b32.xlu1 %v3442_v37, %s3230_s29 }
 0xa00   :  { %1988 = vrot.lane.b32.xlu1 %v3433_v30, %s3231_s30 }
 0xa2e   :  { %v1645_v38 = vpop.xlane.xlu0 %1644 }
 0xa2f   :  { %v1663_v41 = vsub.f32 %v1631_v17, %v1645_v38  ;;  %v1639_v39 = vpop.xlane.xlu1 %1638 }
 0xa30   :  { %v1661_v36 = vsub.f32 %v1629_v4, %v1639_v39 }
 0xa31   :  { %v1673_v45 = vmul.f32 1.442695, %v1663_v41 }
 0xa32   :  { %v1669_v46 = vmul.f32 1.442695, %v1661_v36  ;;  %v1642_v47 = vpop.xlane.xlu0 %1641 }
 0xa33   :  { %3126 = vpow2.f32 %v1673_v45  ;;  %v1662_v50 = vsub.f32 %v1630_v11, %v1642_v47  ;;  %v1648_v44 = vpop.xlane.xlu1 %1647 }
 0xa34   :  { %v1664_v48 = vsub.f32 %v1632_v13, %v1648_v44  ;;  %3128 = vpow2.f32 %v1669_v46 }
 0xa35   :  { %v1671_v49 = vmul.f32 1.442695, %v1662_v50 }
 0xa36   :  { %v1675_v51 = vmul.f32 1.442695, %v1664_v48 }
 0xa37   :  { %3130 = vpow2.f32 %v1671_v49  ;;  %v1716_v58 = vpop.permute.xlu1 %1715 }
 0xa38   :  { %3132 = vpow2.f32 %v1675_v51 }
 0xa3b   :  { %v1775_v52 = vpop.permute.xlu1 %1774 }
 0xa3c   :  { %2892 = vmatprep.subr.bf16.mxu1 %v1775_v52 }
 0xa3d   :  { %v3127_v56 = vpop.eup %3126  ;;  %2893 = vmatpush3.bf16.msra.mxu1 %v1775_v52 }
 0xa3e   :  { %v1657_v55 = vpop.xlane.xlu0 %1656  ;;  %v1691_v60 = vsel %vm36_vm0, %v3127_v56, 0.0  ;;  %v3129_v43 = vpop.eup %3128 }
 0xa3f   :  { %v1667_v7 = vsub.f32 %v1635_v27, %v1657_v55  ;;  %1692 = vadd.xlane.f32.xlu0 %v1691_v60  ;;  %v1685_v62 = vsel %vm36_vm0, %v3129_v43, 0.0 }
 0xa41   :  { %v3131_v53 = vpop.eup %3130  ;;  %v1681_v61 = vmul.f32 1.442695, %v1667_v7 }
 0xa42   :  { %v1651_v2 = vpop.xlane.xlu0 %1650  ;;  %v1688_v63 = vsel %vm36_vm0, %v3131_v53, 0.0  ;;  %v1709_v6 = vpack.c.bf16 %v3131_v53, %v3129_v43  ;;  %v3133_v9 = vpop.eup %3132 }
 0xa43   :  { %3134 = vpow2.f32 %v1681_v61  ;;  %v1665_v1 = vsub.f32 %v1633_v33, %v1651_v2  ;;  %1686 = vadd.xlane.f32.xlu0 %v1685_v62  ;;  %1689 = vadd.xlane.f32.xlu1 %v1688_v63  ;;  %v1694_v17 = vsel %vm36_vm0, %v3133_v9, 0.0  ;;  %v1710_v3 = vpack.c.bf16 %v3133_v9, %v3127_v56 }
 0xa44   :  { %2888 = vmatprep.mubr.msk.bf16.mxu0 %vm36_vm0, %v1709_v6 }
 0xa45   :  { %v1677_v8 = vmul.f32 1.442695, %v1665_v1 }
 0xa46   :  { %v1714_v16 = vpop.permute.xlu0 %1713 }
 0xa47   :  { %3136 = vpow2.f32 %v1677_v8  ;;  %2884 = vmatprep.subr.bf16.mxu0 %v1714_v16  ;;  %1695 = vadd.xlane.f32.xlu0 %v1694_v17 }
 0xa48   :  { %2885 = vmatpush3.bf16.msra.mxu0 %v1714_v16 }
 0xa49   :  { %2886 = vmatprep.subr.bf16.mxu0 %v1716_v58 }
 0xa4a   :  { %v1993_v32 = vpop.permute.xlu0 %1992 }
 0xa4b   :  { %v2003_v38 = vsel %vm522_vm1, %v1993_v32, 0 }
 0xa4c   :  { %2887 = vmatpush3.bf16.msra.mxu0 %v1716_v58 }
 0xa4d   :  { %v3135_v4 = vpop.eup %3134  ;;  %2900 = vmatprep.subr.mxu0 %v23_v18 }
 0xa4e   :  { %v1703_v19 = vsel %vm36_vm0, %v3135_v4, 0.0 }
 0xa4f   :  { %1704 = vadd.xlane.f32.xlu0 %v1703_v19  ;;  %2889 = vmatmul.mubr.msk.bf16.vlgmr.msra.gmra.mrb[32].mxu0 %vm36_vm0, %v1710_v3 }
 0xa50   :  { %2901 = vmatpush3.msra.mxu0 %v23_v18 }
 0xa51   :  { %v3137_v22 = vpop.eup %3136 }
 0xa52   :  { %v1697_v13 = vsel %vm36_vm0, %v3137_v22, 0.0 }
 0xa53   :  { %1698 = vadd.xlane.f32.xlu0 %v1697_v13 }
 0xa54   :  { %2063 = vrot.lane.b32.xlu1 %v3449_v42, %s3230_s29 }
 0xa69   :  { %1990 = vrot.lane.b32.xlu0 %v3438_v34, %s3231_s30 }
 0xa6c   :  { %v1660_v11 = vpop.xlane.xlu1 %1659 }
 0xa6d   :  { %v1668_v24 = vsub.f32 %v3691_v21, %v1660_v11  ;;  %2057 = vrot.lane.b32.xlu0 %v3442_v37, %s3231_s30 }
 0xa6f   :  { %v1683_v25 = vmul.f32 1.442695, %v1668_v24 }
 0xa70   :  { %v1654_v23 = vpop.xlane.xlu1 %1653 }
 0xa71   :  { %3138 = vpow2.f32 %v1683_v25  ;;  %v1666_v26 = vsub.f32 %v3693_v40, %v1654_v23 }
 0xa73   :  { %v1679_v27 = vmul.f32 1.442695, %v1666_v26 }
 0xa74   :  { %v1777_v31 = vpop.permute.xlu1 %1776 }
 0xa75   :  { %3140 = vpow2.f32 %v1679_v27  ;;  %2894 = vmatprep.subr.bf16.mxu1 %v1777_v31 }
 0xa76   :  { %2895 = vmatpush3.bf16.msra.mxu1 %v1777_v31 }
 0xa77   :  { %3012 = vmatprep.subr.msk.bf16.mxu1 %vm522_vm1, %v1993_v32 }
 0xa78   :  { %v1995_v33 = vpop.permute.xlu1 %1994 }
 0xa79   :  { %v2006_v39 = vsel %vm522_vm1, %v1995_v33, 0 }
 0xa7b   :  { %v3139_v20 = vpop.eup %3138 }
 0xa7c   :  { %v2062_v28 = vpop.permute.xlu1 %2061  ;;  %v1706_v5 = vsel %vm36_vm0, %v3139_v20, 0.0  ;;  %v1712_v35 = vpack.c.bf16 %v3139_v20, %v3135_v4 }
 0xa7d   :  { %1707 = vadd.xlane.f32.xlu1 %v1706_v5  ;;  %3014 = vmatprep.subr.msk.bf16.mxu0 %vm522_vm1, %v2062_v28  ;;  %v2072_v62 = vsel %vm522_vm1, %v2062_v28, 0 }
 0xa7f   :  { %v3141_v21 = vpop.eup %3140 }
 0xa80   :  { %v1700_v29 = vsel %vm36_vm0, %v3141_v21, 0.0  ;;  %v1711_v40 = vpack.c.bf16 %v3141_v21, %v3137_v22  ;;  %v1989_v41 = vpop.permute.xlu1 %1988 }
 0xa81   :  { %1701 = vadd.xlane.f32.xlu1 %v1700_v29 }
 0xa82   :  { %2896 = vmatprep.mubr.msk.bf16.mxu1 %vm36_vm0, %v1711_v40 }
 0xa83   :  { %2897 = vmatmul.mubr.msk.bf16.vlgmr.msra.gmra.mrb[40].mxu1 %vm36_vm0, %v1712_v35 }
 0xa84   :  { %2915 = vmatpush3.bf16.xpose.msra.mxu1 %v2003_v38  ;;  %2918 = vmatprep.mubr.msk.bf16.mxu1 %vm522_vm1, %v1989_v41 }
 0xa85   :  { %3013 = vmatprep.subr.msk.bf16.mxu1 %vm522_vm1, %v1995_v33 }
 0xa8c   :  { %2917 = vmatpush3.bf16.xpose.msra.mxu1 %v2006_v39 }
 0xa92   :  { %2059 = vrot.lane.b32.xlu1 %v3449_v42, %s3231_s30 }
 0xacc   :  { %v1693_v36 = vpop.xlane.xlu0 %1692 }
 0xacd   :  { %3142 = vrcp.f32 %v1693_v36 }
 0xad0   :  { %v1687_v45 = vpop.xlane.xlu0 %1686  ;;  %v1690_v48 = vpop.xlane.xlu1 %1689 }
 0xad1   :  { %3144 = vrcp.f32 %v1687_v45 }
 0xad4   :  { %v1696_v46 = vpop.xlane.xlu0 %1695  ;;  %v2064_v63 = vpop.permute.xlu1 %2063 }
 0xad5   :  { %3146 = vrcp.f32 %v1696_v46  ;;  %v2075_v6 = vsel %vm522_vm1, %v2064_v63, 0 }
 0xad6   :  { %3148 = vrcp.f32 %v1690_v48 }
 0xad7   :  { %v3143_v49 = vpop.eup %3142 }
 0xadb   :  { %v3145_v58 = vpop.eup %3144 }
 0xadc   :  { %v1705_v47 = vpop.xlane.xlu0 %1704 }
 0xadd   :  { %3150 = vrcp.f32 %v1705_v47 }
 0xadf   :  { %v3147_v55 = vpop.eup %3146 }
 0xae0   :  { %v1699_v50 = vpop.xlane.xlu0 %1698  ;;  %v3149_v7 = vpop.eup %3148 }
 0xae1   :  { %3152 = vrcp.f32 %v1699_v50 }
 0xae4   :  { %v1991_v44 = vpop.permute.xlu0 %1990 }
 0xae5   :  { %2919 = vmatmul.mubr.msk.bf16.vlgmr.msra.gmra.mrb[44].mxu1 %vm522_vm1, %v1991_v44 }
 0xae7   :  { %v3151_v8 = vpop.eup %3150 }
 0xae8   :  { %v2058_v23 = vpop.permute.xlu0 %2057 }
 0xaeb   :  { %v3153_v17 = vpop.eup %3152 }
 0xb0a   :  { %v1708_v9 = vpop.xlane.xlu1 %1707 }
 0xb0e   :  { %v1702_v1 = vpop.xlane.xlu1 %1701 }
 0xb0f   :  { %3154 = vrcp.f32 %v1702_v1 }
 0xb10   :  { %3156 = vrcp.f32 %v1708_v9 }
 0xb12   :  { %v2060_v26 = vpop.permute.xlu1 %2059 }
 0xb19   :  { %v3155_v22 = vpop.eup %3154 }
 0xb1a   :  { %v3157_v24 = vpop.eup %3156 }
 0xb22   :  { %v2890_v51 = vpop.f32.mrb[32].mxu0 }
 0xb23   :  { %v1845_v52 = vmul.f32 %v3143_v49, %v2890_v51  ;;  %v1759_v56 = vpop.f32.mrb[33].mxu0 }
 0xb24   :  { %v1843_v60 = vmul.f32 %v3145_v58, %v1759_v56  ;;  %v2891_v43 = vpop.f32.mrb[34].mxu0 }
 0xb25   :  { %v1846_v53 = vmul.f32 %v3147_v55, %v2891_v43  ;;  %v1762_v61 = vpop.f32.mrb[35].mxu0 }
 0xb26   :  { %v1844_v2 = vmul.f32 %v3149_v7, %v1762_v61  ;;  %2902 = vmatprep.mubr.msk.f32.mxu0 %vm522_vm1, %v1843_v60 }
 0xb28   :  { %2903 = vmatmul.mubr.msk.f32.vlgmr.msra.gmra.mrb[24].mxu0 %vm522_vm1, %v1844_v2 }
 0xb29   :  { %2923 = vmatpush3.bf16.xpose.msra.mxu0 %v2072_v62  ;;  %2905 = vmatprep.mubr.msk.f32.mxu0 %vm522_vm1, %v1845_v52 }
 0xb2a   :  { %3015 = vmatprep.subr.msk.bf16.mxu0 %vm522_vm1, %v2064_v63 }
 0xb2c   :  { %2906 = vmatmul.mubr.msk.f32.gmra.mrb[26].mxu0 %vm522_vm1, %v1846_v53 }
 0xb31   :  { %2925 = vmatpush3.bf16.xpose.msra.mxu0 %v2075_v6 }
 0xb56   :  { %v2898_v16 = vpop.f32.mrb[40].mxu1 }
 0xb57   :  { %v1849_v18 = vmul.f32 %v3151_v8, %v2898_v16  ;;  %v1820_v4 = vpop.f32.mrb[41].mxu1 }
 0xb58   :  { %v1847_v3 = vmul.f32 %v3153_v17, %v1820_v4  ;;  %v2899_v19 = vpop.f32.mrb[42].mxu1 }
 0xb59   :  { %v1823_v13 = vpop.f32.mrb[43].mxu1  ;;  %v1850_v25 = vmul.f32 %v3157_v24, %v2899_v19 }
 0xb5a   :  { %v1848_v11 = vmul.f32 %v3155_v22, %v1823_v13  ;;  %2908 = vmatprep.mubr.msk.f32.mxu0 %vm522_vm1, %v1847_v3 }
 0xb5c   :  { %2909 = vmatmul.mubr.msk.f32.gmra.mrb[28].mxu0 %vm522_vm1, %v1848_v11 }
 0xb5d   :  { %2911 = vmatprep.mubr.msk.f32.mxu0 %vm522_vm1, %v1849_v18 }
 0xb60   :  { %2912 = vmatmul.mubr.msk.f32.gmra.mrb[30].mxu0 %vm522_vm1, %v1850_v25 }
 0xb61   :  { %2926 = vmatprep.mubr.msk.bf16.mxu0 %vm522_vm1, %v2058_v23 }
 0xb64   :  { %2927 = vmatmul.mubr.msk.bf16.vlgmr.msra.gmra.mrb[36].mxu0 %vm522_vm1, %v2060_v26 }
 0xbb8   :  { %v2920_v27 = vpop.f32.mrb[44].mxu1 }
 0xbb9   :  { %v2128_v31 = vmul.f32 0.35355338, %v2920_v27  ;;  %v2042_v32 = vpop.f32.mrb[45].mxu1 }
 0xbba   :  { %v2921_v33 = vpop.f32.mrb[46].mxu1  ;;  %v2126_v20 = vmul.f32 0.35355338, %v2042_v32 }
 0xbbb   :  { %v2045_v28 = vpop.f32.mrb[47].mxu1  ;;  %v2140_v5 = vsel %vm36_vm0, %v2128_v31, -inf  ;;  %v2129_v40 = vmul.f32 0.35355338, %v2921_v33 }
 0xbbc   :  { %v2127_v21 = vmul.f32 0.35355338, %v2045_v28  ;;  %2141 = vmax.xlane.f32.xlu0 %v2140_v5  ;;  %v2134_v35 = vsel %vm36_vm0, %v2126_v20, -inf }
 0xbbd   :  { %v2143_v38 = vsel %vm36_vm0, %v2129_v40, -inf }
 0xbbe   :  { %v2137_v29 = vsel %vm36_vm0, %v2127_v21, -inf }
 0xbbf   :  { %2138 = vmax.xlane.f32.xlu1 %v2137_v29 }
 0xbc0   :  { %2135 = vmax.xlane.f32.xlu0 %v2134_v35 }
 0xbc4   :  { %2144 = vmax.xlane.f32.xlu0 %v2143_v38 }
 0xbd0   :  { %2212 = vrot.lane.b32.xlu1 %v3438_v34, %s3232_s5 }
 0xbd4   :  { %2271 = vrot.lane.b32.xlu1 %v3442_v37, %s3232_s5 }
 0xc37   :  { %v2928_v41 = vpop.f32.mrb[36].mxu0 }
 0xc38   :  { %v2132_v39 = vmul.f32 0.35355338, %v2928_v41  ;;  %v2111_v36 = vpop.f32.mrb[37].mxu0 }
 0xc39   :  { %v2929_v45 = vpop.f32.mrb[38].mxu0  ;;  %v2130_v46 = vmul.f32 0.35355338, %v2111_v36 }
 0xc3a   :  { %v2133_v47 = vmul.f32 0.35355338, %v2929_v45  ;;  %v2114_v50 = vpop.f32.mrb[39].mxu0  ;;  %v2152_v44 = vsel %vm36_vm0, %v2132_v39, -inf }
 0xc3b   :  { %2153 = vmax.xlane.f32.xlu0 %v2152_v44  ;;  %v2131_v48 = vmul.f32 0.35355338, %v2114_v50  ;;  %v2146_v51 = vsel %vm36_vm0, %v2130_v46, -inf }
 0xc3c   :  { %v2155_v49 = vsel %vm36_vm0, %v2133_v47, -inf }
 0xc3d   :  { %2156 = vmax.xlane.f32.xlu1 %v2155_v49  ;;  %v2149_v34 = vsel %vm36_vm0, %v2131_v48, -inf }
 0xc3f   :  { %2147 = vmax.xlane.f32.xlu0 %v2146_v51 }
 0xc41   :  { %2150 = vmax.xlane.f32.xlu1 %v2149_v34 }
 0xc49   :  { %v2142_v37 = vpop.xlane.xlu0 %2141 }
 0xc4a   :  { %v2160_v52 = vsub.f32 %v2128_v31, %v2142_v37 }
 0xc4c   :  { %v2139_v58 = vpop.xlane.xlu1 %2138  ;;  %v2170_v61 = vmul.f32 1.442695, %v2160_v52 }
 0xc4d   :  { %v2159_v56 = vsub.f32 %v2127_v21, %v2139_v58  ;;  %v2136_v55 = vpop.xlane.xlu0 %2135 }
 0xc4e   :  { %v2158_v60 = vsub.f32 %v2126_v20, %v2136_v55 }
 0xc4f   :  { %v2168_v43 = vmul.f32 1.442695, %v2159_v56 }
 0xc50   :  { %v2166_v7 = vmul.f32 1.442695, %v2158_v60  ;;  %v2213_v53 = vpop.permute.xlu1 %2212 }
 0xc51   :  { %3158 = vpow2.f32 %v2168_v43  ;;  %v2145_v2 = vpop.xlane.xlu0 %2144 }
 0xc52   :  { %3160 = vpow2.f32 %v2166_v7  ;;  %v2161_v62 = vsub.f32 %v2129_v40, %v2145_v2  ;;  %2273 = vrot.lane.b32.xlu1 %v3449_v42, %s3232_s5 }
 0xc53   :  { %3162 = vpow2.f32 %v2170_v61 }
 0xc54   :  { %v2172_v63 = vmul.f32 1.442695, %v2161_v62  ;;  %v2272_v6 = vpop.permute.xlu1 %2271 }
 0xc55   :  { %2938 = vmatprep.subr.bf16.mxu0 %v2272_v6  ;;  %2210 = vrot.lane.b32.xlu0 %v3433_v30, %s3232_s5 }
 0xc56   :  { %3164 = vpow2.f32 %v2172_v63  ;;  %2939 = vmatpush3.bf16.msra.mxu0 %v2272_v6 }
 0xc5b   :  { %v3159_v9 = vpop.eup %3158 }
 0xc5c   :  { %v3161_v1 = vpop.eup %3160  ;;  %v2185_v42 = vsel %vm36_vm0, %v3159_v9, 0.0 }
 0xc5d   :  { %v2206_v8 = vpack.c.bf16 %v3159_v9, %v3161_v1  ;;  %v3163_v16 = vpop.eup %3162  ;;  %v2182_v4 = vsel %vm36_vm0, %v3161_v1, 0.0 }
 0xc5e   :  { %v2188_v3 = vsel %vm36_vm0, %v3163_v16, 0.0 }
 0xc5f   :  { %2934 = vmatprep.mubr.msk.bf16.mxu1 %vm36_vm0, %v2206_v8 }
 0xc60   :  { %v3165_v17 = vpop.eup %3164 }
 0xc61   :  { %v2207_v18 = vpack.c.bf16 %v3165_v17, %v3163_v16  ;;  %v2191_v30 = vsel %vm36_vm0, %v3165_v17, 0.0 }
 0xc74   :  { %2183 = vadd.xlane.f32.xlu0 %v2182_v4 }
 0xc76   :  { %2186 = vadd.xlane.f32.xlu1 %v2185_v42 }
 0xc78   :  { %2189 = vadd.xlane.f32.xlu0 %v2188_v3 }
 0xc7c   :  { %2192 = vadd.xlane.f32.xlu0 %v2191_v30 }
 0xcc8   :  { %v2154_v19 = vpop.xlane.xlu0 %2153 }
 0xcc9   :  { %v2164_v22 = vsub.f32 %v2132_v39, %v2154_v19 }
 0xcca   :  { %v2157_v13 = vpop.xlane.xlu1 %2156 }
 0xccb   :  { %v2165_v11 = vsub.f32 %v2133_v47, %v2157_v13  ;;  %v2178_v24 = vmul.f32 1.442695, %v2164_v22  ;;  %v2611_v22 = vld [vmem:[%s3846_s1 + $0x70] ss:$0 sm:$0xff] }
 0xccc   :  { %v2148_v25 = vpop.xlane.xlu0 %2147 }
 0xccd   :  { %v2162_v23 = vsub.f32 %v2130_v46, %v2148_v25  ;;  %v2180_v26 = vmul.f32 1.442695, %v2165_v11  ;;  %3166 = vpow2.f32 %v2178_v24  ;;  %v24_v46 = vld [vmem:[%s3846_s1 + $0x58] sm:$0xff] }
 0xcce   :  { %v2151_v27 = vpop.xlane.xlu1 %2150 }
 0xccf   :  { %v2174_v31 = vmul.f32 1.442695, %v2162_v23  ;;  %v2163_v32 = vsub.f32 %v2131_v48, %v2151_v27 }
 0xcd0   :  { %v2211_v33 = vpop.permute.xlu0 %2210 }
 0xcd1   :  { %3168 = vpow2.f32 %v2174_v31  ;;  %v2176_v20 = vmul.f32 1.442695, %v2163_v32  ;;  %2930 = vmatprep.subr.bf16.mxu1 %v2211_v33  ;;  %v3190_v31 = vld [vmem:[%s3845_s0 + $0x8] sm:$0xff] }
 0xcd2   :  { %3170 = vpow2.f32 %v2180_v26  ;;  %v2274_v28 = vpop.permute.xlu1 %2273  ;;  %2931 = vmatpush3.bf16.msra.mxu1 %v2211_v33 }
 0xcd3   :  { %3172 = vpow2.f32 %v2176_v20  ;;  %2932 = vmatprep.subr.bf16.mxu1 %v2213_v53  ;;  %2940 = vmatprep.subr.bf16.mxu0 %v2274_v28 }
 0xcd4   :  { %2941 = vmatpush3.bf16.msra.mxu0 %v2274_v28  ;;  %v3191_v28 = vld [vmem:[%s3845_s0] sm:$0xff] }
 0xcd5   :  { %2946 = vmatprep.subr.mxu0 %v24_v46 }
 0xcd6   :  { %2933 = vmatpush3.bf16.msra.mxu1 %v2213_v53 }
 0xcd7   :  { %v3167_v5 = vpop.eup %3166 }
 0xcd8   :  { %v2200_v36 = vsel %vm36_vm0, %v3167_v5, 0.0 }
 0xcd9   :  { %2935 = vmatmul.mubr.msk.bf16.vlgmr.msra.gmra.mrb[48].mxu1 %vm36_vm0, %v2207_v18 }
 0xcdb   :  { %v3169_v21 = vpop.eup %3168 }
 0xcdc   :  { %v3171_v29 = vpop.eup %3170  ;;  %v2194_v40 = vsel %vm36_vm0, %v3169_v21, 0.0 }
 0xcdd   :  { %v3173_v35 = vpop.eup %3172  ;;  %2195 = vadd.xlane.f32.xlu0 %v2194_v40  ;;  %v2209_v39 = vpack.c.bf16 %v3171_v29, %v3167_v5  ;;  %v2203_v45 = vsel %vm36_vm0, %v3171_v29, 0.0  ;;  %v3192_v40 = vld [vmem:[%s3845_s0 + $0x18] sm:$0xff] }
 0xcde   :  { %v2197_v38 = vsel %vm36_vm0, %v3173_v35, 0.0  ;;  %v2208_v41 = vpack.c.bf16 %v3173_v35, %v3169_v21 }
 0xcdf   :  { %2198 = vadd.xlane.f32.xlu1 %v2197_v38 }
 0xce0   :  { %2942 = vmatprep.mubr.msk.bf16.mxu0 %vm36_vm0, %v2208_v41  ;;  %v3193_v41 = vld [vmem:[%s3845_s0 + $0x10] sm:$0xff] }
 0xce1   :  { %2943 = vmatmul.mubr.msk.bf16.vlgmr.msra.gmra.mrb[40].mxu0 %vm36_vm0, %v2209_v39  ;;  %2201 = vadd.xlane.f32.xlu0 %v2200_v36 }
 0xce2   :  { %2947 = vmatpush3.msra.mxu0 %v24_v46 }
 0xce3   :  { %2204 = vadd.xlane.f32.xlu1 %v2203_v45 }
 0xd01   :  { %v2184_v47 = vpop.xlane.xlu0 %2183 }
 0xd02   :  { %3174 = vrcp.f32 %v2184_v47  ;;  %v3194_v47 = vld [vmem:[%s3845_s0 + $0x28] sm:$0xff] }
 0xd03   :  { %v2187_v48 = vpop.xlane.xlu1 %2186 }
 0xd04   :  { %3176 = vrcp.f32 %v2187_v48  ;;  %v3195_v48 = vld [vmem:[%s3845_s0 + $0x20] sm:$0xff] }
 0xd05   :  { %v2190_v50 = vpop.xlane.xlu0 %2189 }
 0xd06   :  { %3178 = vrcp.f32 %v2190_v50 }
 0xd09   :  { %v2193_v44 = vpop.xlane.xlu0 %2192 }
 0xd0a   :  { %3180 = vrcp.f32 %v2193_v44 }
 0xd0c   :  { %v3175_v58 = vpop.eup %3174 }
 0xd0e   :  { %v3177_v43 = vpop.eup %3176 }
 0xd10   :  { %v3179_v53 = vpop.eup %3178 }
 0xd14   :  { %v3181_v62 = vpop.eup %3180 }
 0xd6a   :  { %v2196_v49 = vpop.xlane.xlu0 %2195 }
 0xd6b   :  { %3182 = vrcp.f32 %v2196_v49 }
 0xd6c   :  { %v2199_v51 = vpop.xlane.xlu1 %2198 }
 0xd6d   :  { %3184 = vrcp.f32 %v2199_v51 }
 0xd6e   :  { %v2202_v34 = vpop.xlane.xlu0 %2201 }
 0xd6f   :  { %3186 = vrcp.f32 %v2202_v34 }
 0xd70   :  { %v2205_v56 = vpop.xlane.xlu1 %2204 }
 0xd71   :  { %3188 = vrcp.f32 %v2205_v56 }
 0xd75   :  { %v3183_v9 = vpop.eup %3182 }
 0xd77   :  { %v3185_v17 = vpop.eup %3184 }
 0xd79   :  { %v3187_v4 = vpop.eup %3186 }
 0xd7b   :  { %v3189_v30 = vpop.eup %3188 }
 0xdac   :  { %v2936_v37 = vpop.f32.mrb[48].mxu1 }
 0xdad   :  { %v2256_v52 = vpop.f32.mrb[49].mxu1  ;;  %v2342_v2 = vmul.f32 %v3179_v53, %v2936_v37 }
 0xdae   :  { %v2340_v55 = vmul.f32 %v3175_v58, %v2256_v52  ;;  %v2937_v60 = vpop.f32.mrb[50].mxu1  ;;  %v3197_v58 = vld [vmem:[%s3845_s0 + $0x30] sm:$0xff] }
 0xdaf   :  { %v2259_v7 = vpop.f32.mrb[51].mxu1  ;;  %v2343_v63 = vmul.f32 %v3181_v62, %v2937_v60 }
 0xdb0   :  { %v2341_v61 = vmul.f32 %v3177_v43, %v2259_v7  ;;  %2948 = vmatprep.mubr.msk.f32.mxu0 %vm522_vm1, %v2340_v55 }
 0xdb2   :  { %2949 = vmatmul.mubr.msk.f32.vlgmr.msra.gmra.mrb[24].mxu0 %vm522_vm1, %v2341_v61 }
 0xdb3   :  { %2951 = vmatprep.mubr.msk.f32.mxu0 %vm522_vm1, %v2342_v2 }
 0xdb4   :  { %v2944_v6 = vpop.f32.mrb[40].mxu0 }
 0xdb5   :  { %v2317_v1 = vpop.f32.mrb[41].mxu0  ;;  %v2346_v3 = vmul.f32 %v3187_v4, %v2944_v6 }
 0xdb6   :  { %v2344_v8 = vmul.f32 %v3183_v9, %v2317_v1  ;;  %v2945_v16 = vpop.f32.mrb[42].mxu0  ;;  %2952 = vmatmul.mubr.msk.f32.gmra.mrb[26].mxu0 %vm522_vm1, %v2343_v63 }
 0xdb7   :  { %v2320_v18 = vpop.f32.mrb[43].mxu0  ;;  %v2347_v19 = vmul.f32 %v3189_v30, %v2945_v16 }
 0xdb8   :  { %v2345_v42 = vmul.f32 %v3185_v17, %v2320_v18  ;;  %2954 = vmatprep.mubr.msk.f32.mxu0 %vm522_vm1, %v2344_v8 }
 0xdba   :  { %2955 = vmatmul.mubr.msk.f32.gmra.mrb[28].mxu0 %vm522_vm1, %v2345_v42 }
 0xdbb   :  { %2957 = vmatprep.mubr.msk.f32.mxu0 %vm522_vm1, %v2346_v3 }
 0xdbe   :  { %2958 = vmatmul.mubr.msk.f32.gmra.mrb[30].mxu0 %vm522_vm1, %v2347_v19 }
 0xe85   :  { %v2950_v13 = vpop.f32.mrb[24].mxu0 }
 0xe86   :  { %v2976_v11 = vadd.f32 %v2950_v13, %v3664_v12  ;;  %v2438_v24 = vpop.f32.mrb[25].mxu0 }
 0xe87   :  { %v2977_v25 = vadd.f32 %v2438_v24, %v3666_v10 }
 0xe88   :  { %v2490_v23 = vadd.f32 %v2976_v11, %v2611_v22 }
 0xe89   :  { %v2489_v26 = vadd.f32 %v2977_v25, %v2611_v22  ;;  %v2953_v27 = vpop.f32.mrb[26].mxu0 }
 0xe8a   :  { %v2498_v32 = vadd.f32 %v3190_v31, %v2490_v23  ;;  %v2978_v33 = vadd.f32 %v2953_v27, %v3668_v0  ;;  %v2448_v20 = vpop.f32.mrb[27].mxu0 }
 0xe8b   :  { %v2497_v5 = vadd.f32 %v3191_v28, %v2489_v26  ;;  %v2979_v12 = vadd.f32 %v2448_v20, %v3670_v57 }
 0xe8c   :  { %2506 = vst.msk [vmem:[#allocation2 + $0x8] sm:$0xff] %vm36_vm0, %v2498_v32  ;;  %v2492_v10 = vadd.f32 %v2978_v33, %v2611_v22 }
 0xe8d   :  { %2505 = vst.msk [vmem:[#allocation2] sm:$0xff] %vm36_vm0, %v2497_v5  ;;  %v2491_v21 = vadd.f32 %v2979_v12, %v2611_v22  ;;  %v2956_v29 = vpop.f32.mrb[28].mxu0 }
 0xe8e   :  { %v2500_v0 = vadd.f32 %v3192_v40, %v2492_v10  ;;  %v2980_v35 = vadd.f32 %v2956_v29, %v3672_v54  ;;  %v2458_v38 = vpop.f32.mrb[29].mxu0 }
 0xe8f   :  { %v2499_v57 = vadd.f32 %v3193_v41, %v2491_v21  ;;  %v2981_v39 = vadd.f32 %v2458_v38, %v3674_v14 }
 0xe90   :  { %2508 = vst.msk [vmem:[#allocation2 + $0x18] sm:$0xff] %vm36_vm0, %v2500_v0  ;;  %v2494_v36 = vadd.f32 %v2980_v35, %v2611_v22 }
 0xe91   :  { %2507 = vst.msk [vmem:[#allocation2 + $0x10] sm:$0xff] %vm36_vm0, %v2499_v57  ;;  %v2493_v45 = vadd.f32 %v2981_v39, %v2611_v22  ;;  %v2959_v46 = vpop.f32.mrb[30].mxu0 }
 0xe92   :  { %v2502_v54 = vadd.f32 %v3194_v47, %v2494_v36  ;;  %v2982_v50 = vadd.f32 %v2959_v46, %v3676_v15  ;;  %v2468_v44 = vpop.f32.mrb[31].mxu0  ;;  %v3196_v15 = vld [vmem:[%s3845_s0 + $0x38] sm:$0xff] }
 0xe93   :  { %v2501_v14 = vadd.f32 %v3195_v48, %v2493_v45  ;;  %v2983_v49 = vadd.f32 %v2468_v44, %v3678_v59 }
 0xe94   :  { %2510 = vst.msk [vmem:[#allocation2 + $0x28] sm:$0xff] %vm36_vm0, %v2502_v54  ;;  %v2496_v51 = vadd.f32 %v2982_v50, %v2611_v22 }
 0xe95   :  { %2509 = vst.msk [vmem:[#allocation2 + $0x20] sm:$0xff] %vm36_vm0, %v2501_v14  ;;  %v2495_v34 = vadd.f32 %v2983_v49, %v2611_v22 }
 0xe96   :  { %v2504_v37 = vadd.f32 %v3196_v15, %v2496_v51 }
 0xe97   :  { %v2503_v52 = vadd.f32 %v3197_v58, %v2495_v34 }
 0xe98   :  { %2512 = vst.msk [vmem:[#allocation2 + $0x38] sm:$0xff] %vm36_vm0, %v2504_v37 }
 0xe99   :  { %2511 = vst.msk [vmem:[#allocation2 + $0x30] sm:$0xff] %vm36_vm0, %v2503_v52 }
 0xe9a   :  { %3209 = shalt.err (!%p3206_p4)
}
 0xe9b   :  { %s3210_s30 = scalar_lea.hbm %s3847_s2, 1024 }
 0xe9c   :  { %p3211_p5 = scmp.ne.s32.totalorder %s3847_s2, %s3210_s30  ;;  %p3214_p6 = scmp.lt.u32.totalorder %s3210_s30, %s3847_s2 }
 0xe9e   :  { %p3216_p7 = pnand %p3214_p6, %p3211_p5 }
 0xea0   :  { %3219 = shalt.err (!%p3216_p7)
}
 0xea1   :  { %s3234_s6 = smov 128   ;;  %s3235_s7 = smov 8  }
 0xea2   :  { %2524 = dma.vmem_to_hbm [thread:$0]  %s2519_s22, 1024, %s3847_s2, [#allocation3], %s3234_s6, %s3234_s6, %s3235_s7  }
 0xea3   :  { %3220 = dma.done.wait [#allocation3], 1024  }
 0xea4   :  { %3221 = vsyncadd [#allocation3], 4294966272 }
 0xea5   :  { %2528 = vsyncpa [#allocation3], 1 }

</bundles_post_ra>
